<compile_context>
chip_gen: v7x
topology: tpu7x:2x2x1
jax: 0.10.0
libtpu: 0.0.40
codegen_flags: <defaults>
</compile_context>

<pallas_src>
import functools
import math

import jax
import jax.numpy as jnp
from jax.experimental import pallas as pl
from jax.experimental.pallas import tpu as pltpu


# --------------------------------------------------------------------------
# Pallas kernel
# --------------------------------------------------------------------------

def _attn_block_kernel(x_ref, wqkv_ref, bqkv_ref, wo_ref, bo_ref, o_ref):
    """Fused causal single-head self-attention block; one batch element per step.

    x_ref    : (C, HW)   f32   channels-first tokens (free reshape of NCHW)
    wqkv_ref : (3C, C)   bf16  fused q|k|v weight, PyTorch (out,in) layout,
                               q rows pre-scaled by 1/sqrt(C)
    bqkv_ref : (3C, 1)   f32   fused q|k|v bias (q part pre-scaled)
    wo_ref   : (C, C)    bf16  output-projection weight, PyTorch (out,in) layout
    bo_ref   : (C, 1)    f32   output-projection bias
    o_ref    : (C, HW)   f32   x + attention(x), same channels-first layout
    """
    xr = x_ref[...]                                                # (C, HW) f32
    C = xr.shape[0]

    # Fused q/k/v projection: (3C, C) @ (C, HW) -> (3C, HW); one MXU pass + bias add.
    qkv = jnp.dot(wqkv_ref[...], xr.astype(jnp.bfloat16),
                  preferred_element_type=jnp.float32) + bqkv_ref[...]
    q = qkv[:C]                    # (C, HW), already scaled by 1/sqrt(C)
    k = qkv[C:2 * C]               # (C, HW)
    v = qkv[2 * C:]                # (C, HW)

    # Scores: s[i, j] = q_i . k_j  (contract over channels; no materialized transpose).
    s = jax.lax.dot_general(
        q.astype(jnp.bfloat16), k.astype(jnp.bfloat16),
        dimension_numbers=(((0,), (0,)), ((), ())),
        preferred_element_type=jnp.float32)                        # (HW, HW) f32

    # Causal mask generated in-kernel (iota + select on the VPU; no HBM traffic).
    row = jax.lax.broadcasted_iota(jnp.int32, s.shape, 0)
    col = jax.lax.broadcasted_iota(jnp.int32, s.shape, 1)
    s = jnp.where(col <= row, s, -1e30)

    # Softmax in f32; denominator via EUP approximate reciprocal (free slot).
    m = jnp.max(s, axis=-1, keepdims=True)
    p = jnp.exp(s - m)
    l = jnp.sum(p, axis=-1, keepdims=True)
    p = p * pl.reciprocal(l, approx=True)

    # attn[c, i] = sum_j v[c, j] * p[i, j]   -> (C, HW)
    attn = jax.lax.dot_general(
        v.astype(jnp.bfloat16), p.astype(jnp.bfloat16),
        dimension_numbers=(((1,), (1,)), ((), ())),
        preferred_element_type=jnp.float32)

    # Output projection (PyTorch (out,in) weight used directly) + residual in f32.
    out = jnp.dot(wo_ref[...], attn.astype(jnp.bfloat16),
                  preferred_element_type=jnp.float32) + bo_ref[...]
    o_ref[...] = xr + out


# --------------------------------------------------------------------------
# Wrapper
# --------------------------------------------------------------------------

def attention_block_forward(params, x_nchw):
    """Attention_Block.forward for x of shape (B, C, H, W), n_heads=1, eval mode."""
    B, C, H, W = x_nchw.shape
    HW = H * W
    scale = 1.0 / math.sqrt(C)

    # Channels-first token layout: a free reshape, no transpose / extra HBM traffic.
    x_chw = x_nchw.reshape(B, C, HW).astype(jnp.float32)

    # Fold 1/sqrt(C) into the q rows of the fused projection (constant fold on weights).
    row_scale = jnp.concatenate(
        [jnp.full((C,), scale, jnp.float32), jnp.ones((2 * C,), jnp.float32)])
    wqkv = (params['proj_w'].astype(jnp.float32)
            * row_scale[:, None]).astype(jnp.bfloat16)             # (3C, C) bf16
    bqkv = (params['proj_b'].astype(jnp.float32)
            * row_scale).reshape(3 * C, 1)                         # (3C, 1) f32
    wo = params['out_w'].astype(jnp.bfloat16)                      # (C, C)  bf16
    bo = params['out_b'].astype(jnp.float32).reshape(C, 1)         # (C, 1)  f32

    # Cost estimate: weights/biases counted once (constant index_map => single fetch).
    flops = 2 * B * (HW * C * 3 * C + 2 * HW * HW * C + HW * C * C)
    transcendentals = B * (HW * HW + HW)                           # exp + reciprocal
    bytes_accessed = int(
        2 * B * HW * C * 4                                         # read x, write out
        + wqkv.size * 2 + bqkv.size * 4 + wo.size * 2 + bo.size * 4)

    # Explicit scoped-VMEM limit sized to the live set (with headroom).
    live = (2 * 2 * C * HW * 4                                     # x + out, dbl-buffered
            + 2 * ((wqkv.size + wo.size) * 2 + (bqkv.size + bo.size) * 4)
            + 3 * C * HW * 4                                       # qkv
            + 3 * HW * HW * 4                                      # s / p / exp temps
            + C * HW * 4)                                          # attn
    vmem_limit = int(min(max(2 * live, 8 << 20), 64 << 20))

    out_chw = pl.pallas_call(
        _attn_block_kernel,
        out_shape=jax.ShapeDtypeStruct((B, C, HW), jnp.float32),
        grid=(B,),
        in_specs=[
            pl.BlockSpec((pl.Squeezed(), C, HW), lambda b: (b, 0, 0)),  # x tokens
            pl.BlockSpec((3 * C, C), lambda b: (0, 0)),                 # fused qkv weight
            pl.BlockSpec((3 * C, 1), lambda b: (0, 0)),                 # fused qkv bias
            pl.BlockSpec((C, C), lambda b: (0, 0)),                     # out-proj weight
            pl.BlockSpec((C, 1), lambda b: (0, 0)),                     # out-proj bias
        ],
        out_specs=pl.BlockSpec((pl.Squeezed(), C, HW), lambda b: (b, 0, 0)),
        compiler_params=pltpu.CompilerParams(
            dimension_semantics=("parallel",),                     # batch across TCs
            vmem_limit_bytes=vmem_limit),
        cost_estimate=pl.CostEstimate(
            flops=flops, transcendentals=transcendentals,
            bytes_accessed=bytes_accessed),
    )(x_chw, wqkv, bqkv, wo, bo)

    # Channels-first result -> NCHW is again a free reshape.
    return out_chw.reshape(B, C, H, W)


# --------------------------------------------------------------------------
# Pure-JAX reference (mirrors PyTorch semantics) for verification
# --------------------------------------------------------------------------

def ref_forward(params, x_nchw):
    B, C, H, W = x_nchw.shape
    L = H * W
    tok = jnp.transpose(x_nchw.reshape(B, C, L), (0, 2, 1))        # (B, L, C)
    qkv = tok @ params['proj_w'].T + params['proj_b']
    q, k, v = qkv[..., :C], qkv[..., C:2 * C], qkv[..., 2 * C:]
    s = jnp.einsum('bqc,bkc->bqk', q, k) / math.sqrt(C)
    causal = jnp.tril(jnp.ones((L, L), bool))
    s = jnp.where(causal, s, -jnp.inf)
    p = jax.nn.softmax(s, axis=-1)
    a = jnp.einsum('bqk,bkc->bqc', p, v)
    out = a @ params['out_w'].T + params['out_b']
    res = jnp.transpose(out, (0, 2, 1)).reshape(B, C, H, W)
    return x_nchw + res


# --------------------------------------------------------------------------
# Main
# --------------------------------------------------------------------------

if __name__ == "__main__":
    # C on the sublane axis (multiple of 8), HW = 256 on the lane axis (multiple of 128)
    # so every block / store is dense and MXU passes have M = 256.
    B, C, H, W = 2, 64, 16, 16
    key = jax.random.PRNGKey(0)
    ks = jax.random.split(key, 5)

    params = {
        'proj_w': 0.02 * jax.random.normal(ks[0], (3 * C, C), jnp.float32),
        'proj_b': 0.02 * jax.random.normal(ks[1], (3 * C,), jnp.float32),
        'out_w': 0.02 * jax.random.normal(ks[2], (C, C), jnp.float32),
        'out_b': 0.02 * jax.random.normal(ks[3], (C,), jnp.float32),
    }
    x = jax.random.normal(ks[4], (B, C, H, W), jnp.float32)

    y = jax.jit(attention_block_forward)(params, x)
    y = jax.block_until_ready(y)

    y_ref = ref_forward(params, x)
    assert y.shape == (B, C, H, W)
    max_err = float(jnp.max(jnp.abs(y - y_ref)))
    # bf16 MXU inputs + approx reciprocal => slightly looser tolerance than pure f32.
    assert jnp.allclose(y, y_ref, rtol=1e-2, atol=1e-2), (
        f"mismatch vs pure-JAX reference (max abs err {max_err})")

    print("KERNEL_OK")
</pallas_src>

<mosaic_0001>
module attributes {stable_mosaic.version = 11 : i64} {
  func.func @_attn_block_kernel(%arg0: i32, %arg1: memref<1x64x256xf32, #tpu.memory_space<vmem>>, %arg2: memref<192x64xbf16, #tpu.memory_space<vmem>>, %arg3: memref<192x1xf32, #tpu.memory_space<vmem>>, %arg4: memref<64x64xbf16, #tpu.memory_space<vmem>>, %arg5: memref<64x1xf32, #tpu.memory_space<vmem>>, %arg6: memref<1x64x256xf32, #tpu.memory_space<vmem>>) attributes {dimension_semantics = [#tpu.dimension_semantics<parallel>], iteration_bounds = array<i64: 2>, scalar_prefetch = 0 : i64, scratch_operands = 0 : i64, tpu.core_type = #tpu.core_type<tc>, window_params = [{transform_indices = @transform_0, window_bounds = array<i64: 1, 64, 256>}, {pipeline_mode = #tpu.pipeline_mode<synchronous>, transform_indices = @transform_1, window_bounds = array<i64: 192, 64>}, {pipeline_mode = #tpu.pipeline_mode<synchronous>, transform_indices = @transform_2, window_bounds = array<i64: 192, 1>}, {pipeline_mode = #tpu.pipeline_mode<synchronous>, transform_indices = @transform_3, window_bounds = array<i64: 64, 64>}, {pipeline_mode = #tpu.pipeline_mode<synchronous>, transform_indices = @transform_4, window_bounds = array<i64: 64, 1>}, {transform_indices = @transform_5, window_bounds = array<i64: 1, 64, 256>}]} {
    %c0 = arith.constant 0 : index
    %c0_0 = arith.constant 0 : index
    %c0_1 = arith.constant 0 : index
    %0 = vector.load %arg1[%c0, %c0_0, %c0_1] : memref<1x64x256xf32, #tpu.memory_space<vmem>>, vector<1x64x256xf32>
    %1 = vector.shape_cast %0 : vector<1x64x256xf32> to vector<64x256xf32>
    %c0_2 = arith.constant 0 : index
    %c0_3 = arith.constant 0 : index
    %2 = vector.load %arg2[%c0_2, %c0_3] : memref<192x64xbf16, #tpu.memory_space<vmem>>, vector<192x64xbf16>
    %3 = arith.truncf %1 : vector<64x256xf32> to vector<64x256xbf16>
    %cst = arith.constant dense<0.000000e+00> : vector<192x256xf32>
    %4 = tpu.matmul %2, %3, %cst {dimension_numbers = #tpu.dot_dimension_numbers<[1], [0], [0], [1], [0, 0, 1, 1], [], []>} : vector<192x64xbf16>, vector<64x256xbf16>, vector<192x256xf32> -> vector<192x256xf32>
    %c0_4 = arith.constant 0 : index
    %c0_5 = arith.constant 0 : index
    %5 = vector.load %arg3[%c0_4, %c0_5] : memref<192x1xf32, #tpu.memory_space<vmem>>, vector<192x1xf32>
    %6 = vector.broadcast %5 : vector<192x1xf32> to vector<192x256xf32>
    %7 = arith.addf %4, %6 : vector<192x256xf32>
    %8 = vector.extract_strided_slice %7 {offsets = [0, 0], sizes = [64, 256], strides = [1, 1]} : vector<192x256xf32> to vector<64x256xf32>
    %9 = vector.extract_strided_slice %7 {offsets = [64, 0], sizes = [64, 256], strides = [1, 1]} : vector<192x256xf32> to vector<64x256xf32>
    %10 = vector.extract_strided_slice %7 {offsets = [128, 0], sizes = [64, 256], strides = [1, 1]} : vector<192x256xf32> to vector<64x256xf32>
    %11 = arith.truncf %8 : vector<64x256xf32> to vector<64x256xbf16>
    %12 = arith.truncf %9 : vector<64x256xf32> to vector<64x256xbf16>
    %cst_6 = arith.constant dense<0.000000e+00> : vector<256x256xf32>
    %13 = tpu.matmul %11, %12, %cst_6 {dimension_numbers = #tpu.dot_dimension_numbers<[0], [0], [1], [1], [0, 1, 1, 1], [], []>} : vector<64x256xbf16>, vector<64x256xbf16>, vector<256x256xf32> -> vector<256x256xf32>
    %14 = tpu.iota {dimensions = array<i32: 0>} : vector<256x256xi32>
    %15 = tpu.iota {dimensions = array<i32: 1>} : vector<256x256xi32>
    %16 = arith.cmpi sle, %15, %14 : vector<256x256xi32>
    %cst_7 = arith.constant -1.000000e+30 : f32
    %17 = vector.broadcast %cst_7 : f32 to vector<256x256xf32>
    %18 = arith.select %16, %13, %17 : vector<256x256xi1>, vector<256x256xf32>
    %cst_8 = arith.constant dense<0xFF800000> : vector<256xf32>
    %19 = vector.multi_reduction <maximumf>, %18, %cst_8 [1] : vector<256x256xf32> to vector<256xf32>
    %20 = vector.shape_cast %19 : vector<256xf32> to vector<256x1xf32>
    %21 = vector.broadcast %20 : vector<256x1xf32> to vector<256x256xf32>
    %22 = arith.subf %18, %21 : vector<256x256xf32>
    %23 = math.exp %22 : vector<256x256xf32>
    %cst_9 = arith.constant dense<0.000000e+00> : vector<256xf32>
    %24 = vector.multi_reduction <add>, %23, %cst_9 [1] : vector<256x256xf32> to vector<256xf32>
    %25 = vector.shape_cast %24 : vector<256xf32> to vector<256x1xf32>
    %26 = tpu.reciprocal %25 {approx = true} : vector<256x1xf32> -> vector<256x1xf32>
    %27 = vector.broadcast %26 : vector<256x1xf32> to vector<256x256xf32>
    %28 = arith.mulf %23, %27 : vector<256x256xf32>
    %29 = arith.truncf %10 : vector<64x256xf32> to vector<64x256xbf16>
    %30 = arith.truncf %28 : vector<256x256xf32> to vector<256x256xbf16>
    %cst_10 = arith.constant dense<0.000000e+00> : vector<64x256xf32>
    %31 = tpu.matmul %29, %30, %cst_10 {dimension_numbers = #tpu.dot_dimension_numbers<[1], [1], [0], [0], [0, 0, 1, 0], [], []>} : vector<64x256xbf16>, vector<256x256xbf16>, vector<64x256xf32> -> vector<64x256xf32>
    %c0_11 = arith.constant 0 : index
    %c0_12 = arith.constant 0 : index
    %32 = vector.load %arg4[%c0_11, %c0_12] : memref<64x64xbf16, #tpu.memory_space<vmem>>, vector<64x64xbf16>
    %33 = arith.truncf %31 : vector<64x256xf32> to vector<64x256xbf16>
    %cst_13 = arith.constant dense<0.000000e+00> : vector<64x256xf32>
    %34 = tpu.matmul %32, %33, %cst_13 {dimension_numbers = #tpu.dot_dimension_numbers<[1], [0], [0], [1], [0, 0, 1, 1], [], []>} : vector<64x64xbf16>, vector<64x256xbf16>, vector<64x256xf32> -> vector<64x256xf32>
    %c0_14 = arith.constant 0 : index
    %c0_15 = arith.constant 0 : index
    %35 = vector.load %arg5[%c0_14, %c0_15] : memref<64x1xf32, #tpu.memory_space<vmem>>, vector<64x1xf32>
    %36 = vector.broadcast %35 : vector<64x1xf32> to vector<64x256xf32>
    %37 = arith.addf %34, %36 : vector<64x256xf32>
    %38 = arith.addf %1, %37 : vector<64x256xf32>
    %c0_16 = arith.constant 0 : index
    %c0_17 = arith.constant 0 : index
    %c0_18 = arith.constant 0 : index
    %39 = vector.load %arg6[%c0_16, %c0_17, %c0_18] : memref<1x64x256xf32, #tpu.memory_space<vmem>>, vector<1x64x256xf32>
    %40 = vector.shape_cast %39 : vector<1x64x256xf32> to vector<64x256xf32>
    %41 = vector.shape_cast %38 : vector<64x256xf32> to vector<1x64x256xf32>
    tpu.vector_store %arg6[%c0_16, %c0_17, %c0_18], %41 {strides = array<i32>} : memref<1x64x256xf32, #tpu.memory_space<vmem>>, vector<1x64x256xf32>,
    return
  }
  func.func @transform_0(%arg0: i32) -> (i32, i32, i32) {
    %c0_i32 = arith.constant 0 : i32
    %c0_i32_0 = arith.constant 0 : i32
    %c0_i32_1 = arith.constant 0 : i32
    return %arg0, %c0_i32, %c0_i32_0 : i32, i32, i32
  }
  func.func @transform_1(%arg0: i32) -> (i32, i32) {
    %c0_i32 = arith.constant 0 : i32
    %c0_i32_0 = arith.constant 0 : i32
    %c0_i32_1 = arith.constant 0 : i32
    return %c0_i32, %c0_i32_0 : i32, i32
  }
  func.func @transform_2(%arg0: i32) -> (i32, i32) {
    %c0_i32 = arith.constant 0 : i32
    %c0_i32_0 = arith.constant 0 : i32
    %c0_i32_1 = arith.constant 0 : i32
    return %c0_i32, %c0_i32_0 : i32, i32
  }
  func.func @transform_3(%arg0: i32) -> (i32, i32) {
    %c0_i32 = arith.constant 0 : i32
    %c0_i32_0 = arith.constant 0 : i32
    %c0_i32_1 = arith.constant 0 : i32
    return %c0_i32, %c0_i32_0 : i32, i32
  }
  func.func @transform_4(%arg0: i32) -> (i32, i32) {
    %c0_i32 = arith.constant 0 : i32
    %c0_i32_0 = arith.constant 0 : i32
    %c0_i32_1 = arith.constant 0 : i32
    return %c0_i32, %c0_i32_0 : i32, i32
  }
  func.func @transform_5(%arg0: i32) -> (i32, i32, i32) {
    %c0_i32 = arith.constant 0 : i32
    %c0_i32_0 = arith.constant 0 : i32
    %c0_i32_1 = arith.constant 0 : i32
    return %arg0, %c0_i32, %c0_i32_0 : i32, i32, i32
  }
}

</mosaic_0001>

<bundles_post_ra>
// kernel: mul.9
= control target key start
LH: loop header
LB: loop body
LE: loop exit
PB: predicated region body
PF: predicated region fallthrough
CT: control target
= control target key end

     0   :  { %3 = vsyncpa [#allocation1], 0  ;;  %s46_s9 = smov [#allocation0]   ;;  %s80_s0 = inlined_call_operand.hbm [shape: f32[192], index: 0, kind: input, shape index: {}]   ;;  %s81_s1 = inlined_call_operand.vmem [shape: f32[192], index: 1, kind: input, shape index: {}]   ;;  %s82_s2 = inlined_call_operand.vmem [shape: f32[192], index: 2, kind: output, shape index: {}]  }
   0x1   :  { %s8_s10 = sshll.u32 %s46_s9, 4  ;;  %s22_s13 = scalar_lea.hbm %s80_s0, 32  ;;  %s9_s10 = int_to_ptr.vmem [resolvable:$true] %s8_s10 }
   0x2   :  { %p23_p0 = scmp.ne.s32.totalorder %s80_s0, %s22_s13  ;;  %p26_p1 = scmp.lt.u32.totalorder %s22_s13, %s80_s0 }
   0x4   :  { %p28_p2 = pnand %p26_p1, %p23_p0 }
   0x6   :  { %31 = shalt.err (!%p28_p2)
}
   0x7   :  { %s32_s18 = scalar_lea.vmem %s9_s10, 32  ;;  %p37_p4 = scmp.lt.s32.totalorder %s9_s10, %s9_s10 }
   0x8   :  { %p33_p3 = scmp.ne.s32.totalorder %s9_s10, %s32_s18  ;;  %p38_p5 = scmp.lt.s32.totalorder %s32_s18, %s32_s18 }
   0xa   :  { %p39_p6 = por %p38_p5, %p37_p4 }
   0xc   :  { %p40_p7 = pnand %p39_p6, %p33_p3 }
   0xe   :  { %43 = shalt.err (!%p40_p7)
}
   0xf   :  { %11 = dma.hbm_to_vmem [thread:$0]  %s80_s0, 32, %s9_s10, [#allocation1]  }
  0x10   :  { %44 = dma.done.wait [#allocation1], 32  }
  0x11   :  { %45 = vsyncadd [#allocation1], 4294967264  ;;  %v13_v0 = vld [vmem:[#allocation0] sm:$0x3] }
  0x12   :  { %v14_v1 = vld [vmem:[%s81_s1] sm:$0x3] }
  0x13   :  { %v17_v2 = vmul.f32 %v14_v1, %v13_v0 }
  0x15   :  { %19 = vst [vmem:[%s82_s2] sm:$0x3] %v17_v2 }
  0x16   :  { %20 = vsyncpa [#allocation1], 1 }

// kernel: attention_block_forward.1
= control target key start
LH: loop header
LB: loop body
LE: loop exit
PB: predicated region body
PF: predicated region fallthrough
CT: control target
= control target key end

     0   :  { %s2305_s18 = smov 0   ;;  %s3191_s0 = inlined_call_operand.vmem [shape: f32[2,64,256], index: 0, kind: input, shape index: {}]   ;;  %s3192_s1 = inlined_call_operand.vmem [shape: bf16[192,64], index: 1, kind: input, shape index: {}]   ;;  %s3193_s2 = inlined_call_operand.vmem [shape: f32[192,1], index: 2, kind: input, shape index: {}]   ;;  %s3194_s3 = inlined_call_operand.vmem [shape: bf16[64,64], index: 3, kind: input, shape index: {}]   ;;  %s3195_s4 = inlined_call_operand.vmem [shape: f32[64,1], index: 4, kind: input, shape index: {}]   ;;  %s3196_s5 = inlined_call_operand.vmem [shape: f32[2,64,256], index: 5, kind: output, shape index: {}]  }
   0x1 LB: > { %s1970_s19 = sadd.s32 4294967295, %s2272_s18   ;;  %p1974_p0 = scmp.ge.s32.totalorder %s2272_s18, 1  ;;  %s2272_s18 = sphi %s2305_s18, %s15_s18  }
   0x2   : > { %p187_p1 = scmp.lt.s32.totalorder %s2272_s18, 3 }
   0x4   : > { %p188_p2 = pnand %p1974_p0, %p187_p1 }
   0x6   : > { %191 = sbr.rel (%p188_p2) target bundleno = 1624 (0x658), region = 40 }
   0xd   : > { %p215_p3 = scmp.lt.s32.totalorder %s1970_s19, 1  ;;  %v3197_v0 = vmov 0   ;;  %v274_v20 = vld [vmem:[%s3193_s2] sm:$0xff]  ;;  %v276_v22 = vld [vmem:[%s3193_s2 + $0x10] sm:$0xff]  ;;  %v275_v26 = vld [vmem:[%s3193_s2 + $0x8] sm:$0xff]  ;;  %vm478_vm0 = vcmask 523264  }
   0xe   : > { %547 = vmatprep.mubr.bf16.mxu0 %v3197_v0  ;;  %2040 = vset.pattern.permute.xlu0 %v3197_v0  ;;  %v277_v27 = vld [vmem:[%s3193_s2 + $0x18] sm:$0xff]  ;;  %v278_v29 = vld [vmem:[%s3193_s2 + $0x20] sm:$0xff]  ;;  %v279_v30 = vld [vmem:[%s3193_s2 + $0x28] sm:$0xff] }
   0xf   : > { %s3240_s19 = smov (!%p215_p3, %s1970_s19), 1  ;;  %2041 = vset.pattern.permute.xlu1 %v3197_v0  ;;  %796 = vmatprep.mubr.bf16.mxu1 %v3197_v0  ;;  %v2042_v31 = vld [vmem:[%s3192_s1] sm:$0xff]   ;;  %v280_v32 = vld [vmem:[%s3193_s2 + $0x30] sm:$0xff]  ;;  %v281_v33 = vld [vmem:[%s3193_s2 + $0x38] sm:$0xff] }
  0x10   : > { %s2029_s20 = sshll.u32 %s3240_s19, 7  ;;  %300 = vperm.xlu0 %2040, %v274_v20   ;;  %310 = vperm.xlu1 %2041, %v276_v22   ;;  %v282_v34 = vld [vmem:[%s3193_s2 + $0x40] sm:$0xff]  ;;  %v283_v35 = vld [vmem:[%s3193_s2 + $0x48] sm:$0xff]  ;;  %v284_v37 = vld [vmem:[%s3193_s2 + $0x50] sm:$0xff] }
  0x11   : > { %s2325_s23 = scalar_lea.vmem %s3191_s0, %s2029_s20  ;;  %v2043_v36 = vld [vmem:[%s3192_s1 + $0x8] sm:$0xff]   ;;  %v285_v38 = vld [vmem:[%s3193_s2 + $0x58] sm:$0xff]  ;;  %v286_v39 = vld [vmem:[%s3193_s2 + $0x60] sm:$0xff]  ;;  %s3154_s13 = scalar_lea.vmem %s3196_s5, %s2029_s20 }
  0x12   : > { %v227_v1 = vld [vmem:[%s2325_s23 + $0x8] sm:$0xff]  ;;  %v229_v2 = vld [vmem:[%s2325_s23 + $0x18] sm:$0xff]  ;;  %v226_v3 = vld [vmem:[%s2325_s23] sm:$0xff] }
  0x13   : > { %v267_v4 = vpack.c.bf16 %v229_v2, %v227_v1  ;;  %v228_v5 = vld [vmem:[%s2325_s23 + $0x10] sm:$0xff]  ;;  %v231_v6 = vld [vmem:[%s2325_s23 + $0x28] sm:$0xff]  ;;  %v233_v7 = vld [vmem:[%s2325_s23 + $0x38] sm:$0xff] }
  0x14   : > { %v266_v8 = vpack.c.bf16 %v228_v5, %v226_v3  ;;  %v269_v9 = vpack.c.bf16 %v233_v7, %v231_v6  ;;  %v230_v10 = vld [vmem:[%s2325_s23 + $0x20] sm:$0xff]  ;;  %v232_v11 = vld [vmem:[%s2325_s23 + $0x30] sm:$0xff]  ;;  %v235_v12 = vld [vmem:[%s2325_s23 + $0x48] sm:$0xff]  ;;  %305 = vperm.xlu0 %2040, %v275_v26   ;;  %315 = vperm.xlu1 %2041, %v277_v27  }
  0x15   : > { %515 = vmatprep.subr.bf16.mxu0 %v267_v4  ;;  %v237_v13 = vld [vmem:[%s2325_s23 + $0x58] sm:$0xff]  ;;  %v268_v14 = vpack.c.bf16 %v232_v11, %v230_v10  ;;  %v234_v15 = vld [vmem:[%s2325_s23 + $0x40] sm:$0xff]  ;;  %v236_v17 = vld [vmem:[%s2325_s23 + $0x50] sm:$0xff] }
  0x16   : > { %516 = vmatpush1.bf16.msra.mxu0 %v266_v8  ;;  %v271_v16 = vpack.c.bf16 %v237_v13, %v235_v12  ;;  %v239_v18 = vld [vmem:[%s2325_s23 + $0x68] sm:$0xff]  ;;  %v241_v19 = vld [vmem:[%s2325_s23 + $0x78] sm:$0xff]  ;;  %v270_v21 = vpack.c.bf16 %v236_v17, %v234_v15  ;;  %v238_v24 = vld [vmem:[%s2325_s23 + $0x60] sm:$0xff] }
  0x17   : > { %517 = vmatprep.subr.bf16.mxu0 %v269_v9  ;;  %v273_v23 = vpack.c.bf16 %v241_v19, %v239_v18  ;;  %v240_v25 = vld [vmem:[%s2325_s23 + $0x70] sm:$0xff]  ;;  %v287_v40 = vld [vmem:[%s3193_s2 + $0x68] sm:$0xff]  ;;  %v289_v43 = vld [vmem:[%s3193_s2 + $0x78] sm:$0xff] }
  0x18   : > { %v272_v28 = vpack.c.bf16 %v240_v25, %v238_v24  ;;  %320 = vperm.xlu0 %2040, %v278_v29   ;;  %325 = vperm.xlu1 %2041, %v279_v30   ;;  %v2044_v41 = vld [vmem:[%s3192_s1 + $0x10] sm:$0xff]   ;;  %v2045_v44 = vld [vmem:[%s3192_s1 + $0x18] sm:$0xff]   ;;  %v2046_v45 = vld [vmem:[%s3192_s1 + $0x20] sm:$0xff]  }
  0x19   : > { %v288_v42 = vld [vmem:[%s3193_s2 + $0x70] sm:$0xff]  ;;  %v2047_v46 = vld [vmem:[%s3192_s1 + $0x28] sm:$0xff]   ;;  %v2049_v48 = vld [vmem:[%s3192_s1 + $0x38] sm:$0xff]  }
  0x1a   : > { %518 = vmatpush1.bf16.msra.mxu0 %v268_v14  ;;  %v2048_v47 = vld [vmem:[%s3192_s1 + $0x30] sm:$0xff]  }
  0x1b   : > { %519 = vmatprep.subr.bf16.mxu0 %v271_v16 }
  0x1c   : > { %330 = vperm.xlu0 %2040, %v280_v32   ;;  %335 = vperm.xlu1 %2041, %v281_v33  }
  0x1e   : > { %520 = vmatpush1.bf16.msra.mxu0 %v270_v21 }
  0x1f   : > { %521 = vmatprep.subr.bf16.mxu0 %v273_v23 }
  0x20   : > { %340 = vperm.xlu0 %2040, %v282_v34   ;;  %345 = vperm.xlu1 %2041, %v283_v35  }
  0x22   : > { %522 = vmatpush1.bf16.msra.mxu0 %v272_v28 }
  0x24   : > { %350 = vperm.xlu0 %2040, %v284_v37   ;;  %355 = vperm.xlu1 %2041, %v285_v38  }
  0x25   : > { %1991 = vmatmul.mubr.msk.bf16.vlgmr.msra.gmra.mrb[0].mxu0 %vm478_vm0, %v2042_v31 }
  0x26   : > { %557 = vmatprep.mubr.bf16.mxu0 %v3197_v0 }
  0x28   : > { %360 = vperm.xlu0 %2040, %v286_v39   ;;  %365 = vperm.xlu1 %2041, %v287_v40  }
  0x2c   : > { %370 = vperm.xlu0 %2040, %v288_v42   ;;  %375 = vperm.xlu1 %2041, %v289_v43  }
  0x2d   : > { %1992 = vmatmul.mubr.msk.bf16.gmra.mrb[4].mxu0 %vm478_vm0, %v2043_v36 }
  0x2e   : > { %567 = vmatprep.mubr.bf16.mxu0 %v3197_v0 }
  0x35   : > { %1993 = vmatmul.mubr.msk.bf16.gmra.mrb[8].mxu0 %vm478_vm0, %v2044_v41 }
  0x36   : > { %577 = vmatprep.mubr.bf16.mxu0 %v3197_v0 }
  0x3d   : > { %1994 = vmatmul.mubr.msk.bf16.gmra.mrb[12].mxu0 %vm478_vm0, %v2045_v44 }
  0x3e   : > { %587 = vmatprep.mubr.bf16.mxu0 %v3197_v0 }
  0x45   : > { %1995 = vmatmul.mubr.msk.bf16.gmra.mrb[16].mxu0 %vm478_vm0, %v2046_v45 }
  0x46   : > { %597 = vmatprep.mubr.bf16.mxu0 %v3197_v0 }
  0x4d   : > { %1996 = vmatmul.mubr.msk.bf16.gmra.mrb[20].mxu0 %vm478_vm0, %v2047_v46 }
  0x4e   : > { %607 = vmatprep.mubr.bf16.mxu0 %v3197_v0 }
  0x55   : > { %1997 = vmatmul.mubr.msk.bf16.gmra.mrb[24].mxu0 %vm478_vm0, %v2048_v47 }
  0x56   : > { %617 = vmatprep.mubr.bf16.mxu0 %v3197_v0 }
  0x5d   : > { %1998 = vmatmul.mubr.msk.bf16.gmra.mrb[28].mxu0 %vm478_vm0, %v2049_v48 }
  0x5e   : > { %627 = vmatprep.mubr.bf16.mxu0 %v3197_v0 }
  0x8f   : > { %v301_v49 = vpop.permute.xlu0 %300  ;;  %v311_v57 = vpop.permute.xlu1 %310 }
  0x93   : > { %v306_v52 = vpop.permute.xlu0 %305  ;;  %v316_v1 = vpop.permute.xlu1 %315 }
  0x97   : > { %v321_v11 = vpop.permute.xlu0 %320  ;;  %v326_v13 = vpop.permute.xlu1 %325 }
  0x9b   : > { %v331_v23 = vpop.permute.xlu0 %330  ;;  %v336_v25 = vpop.permute.xlu1 %335 }
  0x9f   : > { %v341_v35 = vpop.permute.xlu0 %340  ;;  %v346_v37 = vpop.permute.xlu1 %345 }
  0xa3   : > { %v351_v47 = vpop.permute.xlu0 %350 }
  0xf8   : > { %v549_v50 = vpop.f32.mrb[0].mxu0 }
  0xf9   : > { %v551_v51 = vpop.f32.mrb[1].mxu0  ;;  %v550_v54 = vadd.f32 %v549_v50, %v301_v49 }
  0xfa   : > { %v553_v53 = vpop.f32.mrb[2].mxu0  ;;  %v552_v58 = vadd.f32 %v551_v51, %v301_v49  ;;  %v356_v49 = vpop.permute.xlu1 %355 }
  0xfb   : > { %v554_v55 = vadd.f32 %v553_v53, %v306_v52  ;;  %v555_v56 = vpop.f32.mrb[3].mxu0 }
  0xfc   : > { %v556_v59 = vadd.f32 %v555_v56, %v306_v52 }
  0xfd   : > { %v668_v60 = vpack.c.bf16 %v554_v55, %v550_v54 }
  0xfe   : > { %v669_v61 = vpack.c.bf16 %v556_v59, %v552_v58  ;;  %v361_v59 = vpop.permute.xlu0 %360 }
  0xff   : > { %684 = vxpose.xlu0.c.b16.start [1/4] (short) %v668_v60, 128 }
 0x100   : > { %v559_v62 = vpop.f32.mrb[4].mxu0  ;;  %700 = vxpose.xlu1.c.b16.start [1/4] (short) %v669_v61, 128  ;;  %v366_v61 = vpop.permute.xlu1 %365 }
 0x101   : > { %v561_v63 = vpop.f32.mrb[5].mxu0  ;;  %v560_v3 = vadd.f32 %v559_v62, %v311_v57 }
 0x102   : > { %v563_v2 = vpop.f32.mrb[6].mxu0  ;;  %v562_v6 = vadd.f32 %v561_v63, %v311_v57 }
 0x103   : > { %v564_v4 = vadd.f32 %v563_v2, %v316_v1  ;;  %v565_v5 = vpop.f32.mrb[7].mxu0 }
 0x104   : > { %v566_v7 = vadd.f32 %v565_v5, %v316_v1 }
 0x105   : > { %v670_v8 = vpack.c.bf16 %v564_v4, %v560_v3 }
 0x106   : > { %v671_v9 = vpack.c.bf16 %v566_v7, %v562_v6 }
 0x107   : > { %685 = vxpose.xlu0.c.b16.cont [2/4] (short) %v670_v8, 128  ;;  %v371_v8 = vpop.permute.xlu0 %370 }
 0x108   : > { %v569_v10 = vpop.f32.mrb[8].mxu0  ;;  %701 = vxpose.xlu1.c.b16.cont [2/4] (short) %v671_v9, 128 }
 0x109   : > { %v571_v12 = vpop.f32.mrb[9].mxu0  ;;  %v570_v15 = vadd.f32 %v569_v10, %v321_v11  ;;  %v376_v10 = vpop.permute.xlu1 %375 }
 0x10a   : > { %v573_v14 = vpop.f32.mrb[10].mxu0  ;;  %v572_v18 = vadd.f32 %v571_v12, %v321_v11 }
 0x10b   : > { %v574_v16 = vadd.f32 %v573_v14, %v326_v13  ;;  %v575_v17 = vpop.f32.mrb[11].mxu0 }
 0x10c   : > { %v576_v19 = vadd.f32 %v575_v17, %v326_v13 }
 0x10d   : > { %v672_v20 = vpack.c.bf16 %v574_v16, %v570_v15 }
 0x10e   : > { %v673_v21 = vpack.c.bf16 %v576_v19, %v572_v18 }
 0x10f   : > { %686 = vxpose.xlu0.c.b16.cont [3/4] (short) %v672_v20, 128 }
 0x110   : > { %v579_v22 = vpop.f32.mrb[12].mxu0  ;;  %702 = vxpose.xlu1.c.b16.cont [3/4] (short) %v673_v21, 128 }
 0x111   : > { %v581_v24 = vpop.f32.mrb[13].mxu0  ;;  %v580_v27 = vadd.f32 %v579_v22, %v331_v23 }
 0x112   : > { %v583_v26 = vpop.f32.mrb[14].mxu0  ;;  %v582_v30 = vadd.f32 %v581_v24, %v331_v23 }
 0x113   : > { %v584_v28 = vadd.f32 %v583_v26, %v336_v25  ;;  %v585_v29 = vpop.f32.mrb[15].mxu0 }
 0x114   : > { %v586_v31 = vadd.f32 %v585_v29, %v336_v25 }
 0x115   : > { %v674_v32 = vpack.c.bf16 %v584_v28, %v580_v27 }
 0x116   : > { %v675_v33 = vpack.c.bf16 %v586_v31, %v582_v30 }
 0x117   : > { %687 = vxpose.xlu0.c.b16.end [4/4] (short) %v674_v32, 128 }
 0x118   : > { %v589_v34 = vpop.f32.mrb[16].mxu0  ;;  %703 = vxpose.xlu1.c.b16.end [4/4] (short) %v675_v33, 128 }
 0x119   : > { %v591_v36 = vpop.f32.mrb[17].mxu0  ;;  %v590_v39 = vadd.f32 %v589_v34, %v341_v35 }
 0x11a   : > { %v593_v38 = vpop.f32.mrb[18].mxu0  ;;  %v592_v42 = vadd.f32 %v591_v36, %v341_v35  ;;  %v957_v35 = vlaneseq }
 0x11b   : > { %v594_v40 = vadd.f32 %v593_v38, %v346_v37  ;;  %v595_v41 = vpop.f32.mrb[19].mxu0 }
 0x11c   : > { %v596_v43 = vadd.f32 %v595_v41, %v346_v37  ;;  %v2463_v36 = vshrl.u32 %v957_v35, 7  ;;  %v2465_v37 = vand.u32 127, %v957_v35 }
 0x11d   : > { %v676_v44 = vpack.c.bf16 %v594_v40, %v590_v39 }
 0x11e   : > { %v677_v45 = vpack.c.bf16 %v596_v43, %v592_v42  ;;  %v959_v38 = vadd.s32 8, %v2463_v36  ;;  %vm993_vm1 = vcmp.le.s32.totalorder %v2465_v37, %v2463_v36  ;;  %v971_v35 = vadd.s32 104, %v2463_v36 }
 0x120   : > { %v599_v46 = vpop.f32.mrb[20].mxu0  ;;  %764 = vmatprep.subr.bf16.mxu1 %v677_v45  ;;  %vm995_vm2 = vcmp.le.s32.totalorder %v2465_v37, %v959_v38  ;;  %vm1019_vm14 = vcmp.le.s32.totalorder %v2465_v37, %v971_v35 }
 0x121   : > { %v601_v48 = vpop.f32.mrb[21].mxu0  ;;  %765 = vmatpush1.bf16.msra.mxu1 %v676_v44  ;;  %v600_v51 = vadd.f32 %v599_v46, %v351_v47  ;;  %v960_v44 = vadd.s32 16, %v2463_v36 }
 0x122   : > { %v603_v50 = vpop.f32.mrb[22].mxu0  ;;  %v602_v54 = vadd.f32 %v601_v48, %v351_v47  ;;  %v961_v48 = vadd.s32 24, %v2463_v36 }
 0x123   : > { %v604_v52 = vadd.f32 %v603_v50, %v356_v49  ;;  %v605_v53 = vpop.f32.mrb[23].mxu0  ;;  %vm997_vm3 = vcmp.le.s32.totalorder %v2465_v37, %v960_v44  ;;  %v972_v44 = vadd.s32 112, %v2463_v36 }
 0x124   : > { %v606_v55 = vadd.f32 %v605_v53, %v356_v49  ;;  %vm999_vm4 = vcmp.le.s32.totalorder %v2465_v37, %v961_v48 }
 0x125   : > { %v678_v56 = vpack.c.bf16 %v604_v52, %v600_v51  ;;  %vm1021_vm15 = vcmp.le.s32.totalorder %v2465_v37, %v972_v44 }
 0x126   : > { %v679_v57 = vpack.c.bf16 %v606_v55, %v602_v54  ;;  %v962_v54 = vadd.s32 32, %v2463_v36 }
 0x128   : > { %v609_v58 = vpop.f32.mrb[24].mxu0  ;;  %766 = vmatprep.subr.bf16.mxu1 %v679_v57  ;;  %vm1001_vm5 = vcmp.le.s32.totalorder %v2465_v37, %v962_v54 }
 0x129   : > { %v611_v60 = vpop.f32.mrb[25].mxu0  ;;  %767 = vmatpush1.bf16.msra.mxu1 %v678_v56  ;;  %v610_v63 = vadd.f32 %v609_v58, %v361_v59  ;;  %v963_v58 = vadd.s32 40, %v2463_v36 }
 0x12a   : > { %v613_v62 = vpop.f32.mrb[26].mxu0  ;;  %v612_v3 = vadd.f32 %v611_v60, %v361_v59 }
 0x12b   : > { %v614_v1 = vadd.f32 %v613_v62, %v366_v61  ;;  %v615_v2 = vpop.f32.mrb[27].mxu0  ;;  %vm1003_vm6 = vcmp.le.s32.totalorder %v2465_v37, %v963_v58 }
 0x12c   : > { %v616_v4 = vadd.f32 %v615_v2, %v366_v61 }
 0x12d   : > { %v680_v5 = vpack.c.bf16 %v614_v1, %v610_v63  ;;  %v964_v1 = vadd.s32 48, %v2463_v36 }
 0x12e   : > { %v681_v6 = vpack.c.bf16 %v616_v4, %v612_v3 }
 0x12f   : > { %vm1005_vm7 = vcmp.le.s32.totalorder %v2465_v37, %v964_v1 }
 0x130   : > { %v619_v7 = vpop.f32.mrb[28].mxu0  ;;  %768 = vmatprep.subr.bf16.mxu1 %v681_v6 }
 0x131   : > { %v621_v9 = vpop.f32.mrb[29].mxu0  ;;  %769 = vmatpush1.bf16.msra.mxu1 %v680_v5  ;;  %v620_v12 = vadd.f32 %v619_v7, %v371_v8  ;;  %v965_v5 = vadd.s32 56, %v2463_v36 }
 0x132   : > { %v623_v11 = vpop.f32.mrb[30].mxu0  ;;  %v622_v15 = vadd.f32 %v621_v9, %v371_v8 }
 0x133   : > { %v624_v13 = vadd.f32 %v623_v11, %v376_v10  ;;  %v625_v14 = vpop.f32.mrb[31].mxu0  ;;  %vm1007_vm8 = vcmp.le.s32.totalorder %v2465_v37, %v965_v5  ;;  %v966_v11 = vadd.s32 64, %v2463_v36 }
 0x134   : > { %v626_v16 = vadd.f32 %v625_v14, %v376_v10 }
 0x135   : > { %v682_v17 = vpack.c.bf16 %v624_v13, %v620_v12  ;;  %vm1009_vm9 = vcmp.le.s32.totalorder %v2465_v37, %v966_v11  ;;  %v977_v11 = vadd.s32 152, %v2463_v36 }
 0x136   : > { %v683_v18 = vpack.c.bf16 %v626_v16, %v622_v15  ;;  %v967_v15 = vadd.s32 72, %v2463_v36 }
 0x138   : > { %770 = vmatprep.subr.bf16.mxu1 %v683_v18  ;;  %vm1011_vm10 = vcmp.le.s32.totalorder %v2465_v37, %v967_v15 }
 0x139   : > { %771 = vmatpush1.bf16.msra.mxu1 %v682_v17 }
 0x171   : > { %v692_v19 = vpop.trf.xlu0 }
 0x172   : > { %2003 = vmatmul.mubr.msk.bf16.vlgmr.msra.gmra.mrb[0].mxu1 %vm478_vm0, %v692_v19  ;;  %v708_v27 = vpop.trf.xlu1 }
 0x173   : > { %806 = vmatprep.mubr.bf16.mxu1 %v3197_v0 }
 0x175   : > { %v693_v20 = vpop.trf.xlu0 }
 0x176   : > { %v709_v28 = vpop.trf.xlu1 }
 0x179   : > { %v694_v21 = vpop.trf.xlu0 }
 0x17a   : > { %2004 = vmatmul.mubr.msk.bf16.gmra.mrb[4].mxu1 %vm478_vm0, %v693_v20  ;;  %v710_v29 = vpop.trf.xlu1 }
 0x17b   : > { %816 = vmatprep.mubr.bf16.mxu1 %v3197_v0 }
 0x17d   : > { %v695_v22 = vpop.trf.xlu0 }
 0x17e   : > { %v711_v30 = vpop.trf.xlu1 }
 0x181   : > { %v696_v23 = vpop.trf.xlu0 }
 0x182   : > { %2005 = vmatmul.mubr.msk.bf16.gmra.mrb[8].mxu1 %vm478_vm0, %v694_v21  ;;  %v712_v31 = vpop.trf.xlu1  ;;  %v968_v21 = vadd.s32 80, %v2463_v36 }
 0x183   : > { %826 = vmatprep.mubr.bf16.mxu1 %v3197_v0 }
 0x184   : > { %vm1013_vm11 = vcmp.le.s32.totalorder %v2465_v37, %v968_v21 }
 0x185   : > { %v697_v24 = vpop.trf.xlu0 }
 0x186   : > { %v713_v32 = vpop.trf.xlu1 }
 0x189   : > { %v698_v25 = vpop.trf.xlu0 }
 0x18a   : > { %2006 = vmatmul.mubr.msk.bf16.gmra.mrb[12].mxu1 %vm478_vm0, %v695_v22  ;;  %v714_v33 = vpop.trf.xlu1 }
 0x18b   : > { %836 = vmatprep.mubr.bf16.mxu1 %v3197_v0 }
 0x18d   : > { %v699_v26 = vpop.trf.xlu0 }
 0x18e   : > { %v715_v34 = vpop.trf.xlu1 }
 0x192   : > { %2007 = vmatmul.mubr.msk.bf16.gmra.mrb[16].mxu1 %vm478_vm0, %v696_v23 }
 0x193   : > { %846 = vmatprep.mubr.bf16.mxu1 %v3197_v0 }
 0x19a   : > { %2008 = vmatmul.mubr.msk.bf16.gmra.mrb[20].mxu1 %vm478_vm0, %v697_v24 }
 0x19b   : > { %856 = vmatprep.mubr.bf16.mxu1 %v3197_v0 }
 0x1a2   : > { %2009 = vmatmul.mubr.msk.bf16.gmra.mrb[24].mxu1 %vm478_vm0, %v698_v25  ;;  %v969_v25 = vadd.s32 88, %v2463_v36 }
 0x1a3   : > { %866 = vmatprep.mubr.bf16.mxu1 %v3197_v0 }
 0x1a4   : > { %vm1015_vm12 = vcmp.le.s32.totalorder %v2465_v37, %v969_v25 }
 0x1aa   : > { %2010 = vmatmul.mubr.msk.bf16.gmra.mrb[28].mxu1 %vm478_vm0, %v699_v26 }
 0x1ab   : > { %876 = vmatprep.mubr.bf16.mxu1 %v3197_v0 }
 0x1b2   : > { %2011 = vmatmul.mubr.msk.bf16.gmra.mrb[32].mxu1 %vm478_vm0, %v708_v27 }
 0x1b3   : > { %886 = vmatprep.mubr.bf16.mxu1 %v3197_v0 }
 0x1ba   : > { %2012 = vmatmul.mubr.msk.bf16.gmra.mrb[36].mxu1 %vm478_vm0, %v709_v28 }
 0x1bb   : > { %896 = vmatprep.mubr.bf16.mxu1 %v3197_v0 }
 0x1c2   : > { %2013 = vmatmul.mubr.msk.bf16.gmra.mrb[40].mxu1 %vm478_vm0, %v710_v29 }
 0x1c3   : > { %906 = vmatprep.mubr.bf16.mxu1 %v3197_v0 }
 0x1ca   : > { %2014 = vmatmul.mubr.msk.bf16.gmra.mrb[44].mxu1 %vm478_vm0, %v711_v30 }
 0x1cb   : > { %916 = vmatprep.mubr.bf16.mxu1 %v3197_v0 }
 0x1d2   : > { %2015 = vmatmul.mubr.msk.bf16.gmra.mrb[48].mxu1 %vm478_vm0, %v712_v31  ;;  %v970_v31 = vadd.s32 96, %v2463_v36 }
 0x1d3   : > { %926 = vmatprep.mubr.bf16.mxu1 %v3197_v0 }
 0x1d4   : > { %vm1017_vm13 = vcmp.le.s32.totalorder %v2465_v37, %v970_v31 }
 0x1da   : > { %2016 = vmatmul.mubr.msk.bf16.gmra.mrb[52].mxu1 %vm478_vm0, %v713_v32 }
 0x1db   : > { %936 = vmatprep.mubr.bf16.mxu1 %v3197_v0 }
 0x1e2   : > { %2017 = vmatmul.mubr.msk.bf16.gmra.mrb[56].mxu1 %vm478_vm0, %v714_v33 }
 0x1e3   : > { %946 = vmatprep.mubr.bf16.mxu1 %v3197_v0 }
 0x1ea   : > { %2018 = vmatmul.mubr.msk.bf16.gmra.mrb[60].mxu1 %vm478_vm0, %v715_v34 }
 0x1eb   : > { %1842 = vmatprep.mubr.bf16.mxu1 %v3197_v0 }
 0x245   : > { %v798_v39 = vpop.f32.mrb[0].mxu1 }
 0x246   : > { %v2471_v40 = vsel %vm993_vm1, %v798_v39, -1e+30  ;;  %v800_v41 = vpop.f32.mrb[1].mxu1 }
 0x247   : > { %v802_v42 = vpop.f32.mrb[2].mxu1  ;;  %v1121_v43 = vmax.f32 %v2471_v40, -1e+30 }
 0x248   : > { %v2475_v45 = vsel %vm995_vm2, %v802_v42, -1e+30  ;;  %v804_v46 = vpop.f32.mrb[3].mxu1 }
 0x249   : > { %1122 = vmax.xlane.f32.xlu0 %v1121_v43  ;;  %v1124_v47 = vmax.f32 %v2475_v45, -1e+30 }
 0x24b   : > { %1125 = vmax.xlane.f32.xlu1 %v1124_v47 }
 0x24d   : > { %v808_v49 = vpop.f32.mrb[4].mxu1 }
 0x24e   : > { %v2481_v50 = vsel %vm997_vm3, %v808_v49, -1e+30  ;;  %v810_v51 = vpop.f32.mrb[5].mxu1  ;;  %v973_v49 = vadd.s32 120, %v2463_v36 }
 0x24f   : > { %v1127_v52 = vmax.f32 %v2481_v50, -1e+30  ;;  %v812_v53 = vpop.f32.mrb[6].mxu1 }
 0x250   : > { %v2485_v55 = vsel %vm999_vm4, %v812_v53, -1e+30  ;;  %v814_v56 = vpop.f32.mrb[7].mxu1  ;;  %vm1023_vm1 = vcmp.le.s32.totalorder %v2465_v37, %v973_v49  ;;  %v982_v49 = vadd.s32 192, %v2463_v36 }
 0x251   : > { %1128 = vmax.xlane.f32.xlu0 %v1127_v52  ;;  %v1130_v57 = vmax.f32 %v2485_v55, -1e+30 }
 0x255   : > { %1131 = vmax.xlane.f32.xlu0 %v1130_v57  ;;  %v818_v59 = vpop.f32.mrb[8].mxu1 }
 0x256   : > { %v2491_v60 = vsel %vm1001_vm5, %v818_v59, -1e+30  ;;  %v820_v61 = vpop.f32.mrb[9].mxu1  ;;  %v974_v59 = vadd.s32 128, %v2463_v36 }
 0x257   : > { %v822_v62 = vpop.f32.mrb[10].mxu1  ;;  %v1133_v63 = vmax.f32 %v2491_v60, -1e+30  ;;  %v2548_v61 = vadd.s32 128, %v2465_v37 }
 0x258   : > { %v2495_v2 = vsel %vm1003_vm6, %v822_v62, -1e+30  ;;  %v824_v3 = vpop.f32.mrb[11].mxu1 }
 0x259   : > { %1134 = vmax.xlane.f32.xlu1 %v1133_v63  ;;  %v1136_v4 = vmax.f32 %v2495_v2, -1e+30  ;;  %v975_v63 = vadd.s32 136, %v2463_v36  ;;  %vm1026_vm2 = vcmp.le.s32.totalorder %v2548_v61, %v974_v59  ;;  %vm1032_vm5 = vcmp.le.s32.totalorder %v2548_v61, %v977_v11 }
 0x25b   : > { %1137 = vmax.xlane.f32.xlu0 %v1136_v4  ;;  %vm1028_vm3 = vcmp.le.s32.totalorder %v2548_v61, %v975_v63 }
 0x25d   : > { %v828_v6 = vpop.f32.mrb[12].mxu1 }
 0x25e   : > { %v2501_v7 = vsel %vm1005_vm7, %v828_v6, -1e+30  ;;  %v830_v8 = vpop.f32.mrb[13].mxu1 }
 0x25f   : > { %v832_v9 = vpop.f32.mrb[14].mxu1  ;;  %v1139_v10 = vmax.f32 %v2501_v7, -1e+30  ;;  %v976_v8 = vadd.s32 144, %v2463_v36 }
 0x260   : > { %v2505_v12 = vsel %vm1007_vm8, %v832_v9, -1e+30  ;;  %v834_v13 = vpop.f32.mrb[15].mxu1 }
 0x261   : > { %1140 = vmax.xlane.f32.xlu1 %v1139_v10  ;;  %v1142_v14 = vmax.f32 %v2505_v12, -1e+30  ;;  %vm1030_vm4 = vcmp.le.s32.totalorder %v2548_v61, %v976_v8 }
 0x263   : > { %1143 = vmax.xlane.f32.xlu0 %v1142_v14 }
 0x265   : > { %v838_v16 = vpop.f32.mrb[16].mxu1 }
 0x266   : > { %v2511_v17 = vsel %vm1009_vm9, %v838_v16, -1e+30  ;;  %v840_v18 = vpop.f32.mrb[17].mxu1 }
 0x267   : > { %v842_v19 = vpop.f32.mrb[18].mxu1  ;;  %v1145_v20 = vmax.f32 %v2511_v17, -1e+30 }
 0x268   : > { %v2515_v22 = vsel %vm1011_vm10, %v842_v19, -1e+30  ;;  %v844_v23 = vpop.f32.mrb[19].mxu1  ;;  %vm1042_vm10 = vcmp.le.s32.totalorder %v2548_v61, %v982_v49 }
 0x269   : > { %1146 = vmax.xlane.f32.xlu1 %v1145_v20  ;;  %v1148_v24 = vmax.f32 %v2515_v22, -1e+30  ;;  %v978_v20 = vadd.s32 160, %v2463_v36 }
 0x26b   : > { %1149 = vmax.xlane.f32.xlu0 %v1148_v24  ;;  %v979_v24 = vadd.s32 168, %v2463_v36  ;;  %vm1034_vm6 = vcmp.le.s32.totalorder %v2548_v61, %v978_v20 }
 0x26d   : > { %v848_v26 = vpop.f32.mrb[20].mxu1  ;;  %vm1036_vm7 = vcmp.le.s32.totalorder %v2548_v61, %v979_v24 }
 0x26e   : > { %v2521_v27 = vsel %vm1013_vm11, %v848_v26, -1e+30  ;;  %v850_v28 = vpop.f32.mrb[21].mxu1 }
 0x26f   : > { %v852_v29 = vpop.f32.mrb[22].mxu1  ;;  %v1151_v30 = vmax.f32 %v2521_v27, -1e+30 }
 0x270   : > { %v2525_v32 = vsel %vm1015_vm12, %v852_v29, -1e+30  ;;  %v854_v33 = vpop.f32.mrb[23].mxu1 }
 0x271   : > { %1152 = vmax.xlane.f32.xlu1 %v1151_v30  ;;  %v1154_v34 = vmax.f32 %v2525_v32, -1e+30  ;;  %v980_v33 = vadd.s32 176, %v2463_v36 }
 0x273   : > { %1155 = vmax.xlane.f32.xlu0 %v1154_v34  ;;  %vm1038_vm8 = vcmp.le.s32.totalorder %v2548_v61, %v980_v33 }
 0x275   : > { %v858_v38 = vpop.f32.mrb[24].mxu1 }
 0x276   : > { %v2531_v39 = vsel %vm1017_vm13, %v858_v38, -1e+30  ;;  %v860_v41 = vpop.f32.mrb[25].mxu1  ;;  %v981_v38 = vadd.s32 184, %v2463_v36 }
 0x277   : > { %v862_v42 = vpop.f32.mrb[26].mxu1  ;;  %v1157_v43 = vmax.f32 %v2531_v39, -1e+30 }
 0x278   : > { %v2535_v46 = vsel %vm1019_vm14, %v862_v42, -1e+30  ;;  %v864_v47 = vpop.f32.mrb[27].mxu1  ;;  %vm1040_vm9 = vcmp.le.s32.totalorder %v2548_v61, %v981_v38 }
 0x279   : > { %1158 = vmax.xlane.f32.xlu1 %v1157_v43  ;;  %v1160_v48 = vmax.f32 %v2535_v46, -1e+30 }
 0x27b   : > { %1161 = vmax.xlane.f32.xlu0 %v1160_v48 }
 0x27d   : > { %v868_v51 = vpop.f32.mrb[28].mxu1 }
 0x27e   : > { %v2541_v52 = vsel %vm1021_vm15, %v868_v51, -1e+30  ;;  %v870_v53 = vpop.f32.mrb[29].mxu1 }
 0x27f   : > { %v872_v54 = vpop.f32.mrb[30].mxu1  ;;  %v1163_v56 = vmax.f32 %v2541_v52, -1e+30 }
 0x280   : > { %v2544_v57 = vsel %vm1023_vm1, %v872_v54, -1e+30  ;;  %v874_v58 = vpop.f32.mrb[31].mxu1 }
 0x281   : > { %1164 = vmax.xlane.f32.xlu1 %v1163_v56  ;;  %v1166_v62 = vmax.f32 %v2544_v57, -1e+30 }
 0x283   : > { %1167 = vmax.xlane.f32.xlu0 %v1166_v62 }
 0x285   : > { %v2553_v1 = vpop.f32.mrb[32].mxu1 }
 0x286   : > { %v880_v3 = vpop.f32.mrb[33].mxu1 }
 0x287   : > { %v2556_v4 = vsel %vm1026_vm2, %v880_v3, -1e+30  ;;  %v2558_v5 = vpop.f32.mrb[34].mxu1 }
 0x288   : > { %v884_v6 = vpop.f32.mrb[35].mxu1  ;;  %v1169_v37 = vmax.f32 %v2553_v1, %v2556_v4 }
 0x289   : > { %v2563_v9 = vsel %vm1028_vm3, %v884_v6, -1e+30 }
 0x28a   : > { %1170 = vmax.xlane.f32.xlu1 %v1169_v37  ;;  %v1172_v10 = vmax.f32 %v2558_v5, %v2563_v9 }
 0x28c   : > { %1173 = vmax.xlane.f32.xlu0 %v1172_v10 }
 0x28d   : > { %v2569_v13 = vpop.f32.mrb[36].mxu1 }
 0x28e   : > { %v890_v14 = vpop.f32.mrb[37].mxu1 }
 0x28f   : > { %v2572_v15 = vsel %vm1030_vm4, %v890_v14, -1e+30  ;;  %v2574_v16 = vpop.f32.mrb[38].mxu1 }
 0x290   : > { %v894_v18 = vpop.f32.mrb[39].mxu1  ;;  %v1175_v19 = vmax.f32 %v2569_v13, %v2572_v15 }
 0x291   : > { %v2579_v21 = vsel %vm1032_vm5, %v894_v18, -1e+30 }
 0x292   : > { %1176 = vmax.xlane.f32.xlu1 %v1175_v19  ;;  %v1178_v23 = vmax.f32 %v2574_v16, %v2579_v21 }
 0x294   : > { %1179 = vmax.xlane.f32.xlu0 %v1178_v23 }
 0x295   : > { %v2585_v25 = vpop.f32.mrb[40].mxu1 }
 0x296   : > { %v900_v26 = vpop.f32.mrb[41].mxu1 }
 0x297   : > { %v2588_v28 = vsel %vm1034_vm6, %v900_v26, -1e+30  ;;  %v2590_v29 = vpop.f32.mrb[42].mxu1  ;;  %v2050_v26 = vld [vmem:[%s3192_s1 + $0x40] sm:$0xff]  }
 0x298   : > { %v904_v30 = vpop.f32.mrb[43].mxu1  ;;  %v1181_v31 = vmax.f32 %v2585_v25, %v2588_v28  ;;  %1999 = vmatmul.mubr.msk.bf16.gmra.mrb[32].mxu0 %vm478_vm0, %v2050_v26 }
 0x299   : > { %v2595_v34 = vsel %vm1036_vm7, %v904_v30, -1e+30  ;;  %637 = vmatprep.mubr.bf16.mxu0 %v3197_v0  ;;  %v2051_v30 = vld [vmem:[%s3192_s1 + $0x48] sm:$0xff]  }
 0x29a   : > { %1182 = vmax.xlane.f32.xlu1 %v1181_v31  ;;  %v1184_v35 = vmax.f32 %v2590_v29, %v2595_v34  ;;  %v2052_v31 = vld [vmem:[%s3192_s1 + $0x50] sm:$0xff]  }
 0x29c   : > { %1185 = vmax.xlane.f32.xlu0 %v1184_v35 }
 0x29d   : > { %v2601_v41 = vpop.f32.mrb[44].mxu1 }
 0x29e   : > { %v910_v42 = vpop.f32.mrb[45].mxu1 }
 0x29f   : > { %v2604_v43 = vsel %vm1038_vm8, %v910_v42, -1e+30  ;;  %v2606_v44 = vpop.f32.mrb[46].mxu1 }
 0x2a0   : > { %v914_v47 = vpop.f32.mrb[47].mxu1  ;;  %v1187_v48 = vmax.f32 %v2601_v41, %v2604_v43  ;;  %2000 = vmatmul.mubr.msk.bf16.gmra.mrb[36].mxu0 %vm478_vm0, %v2051_v30 }
 0x2a1   : > { %v2611_v51 = vsel %vm1040_vm9, %v914_v47, -1e+30  ;;  %647 = vmatprep.mubr.bf16.mxu0 %v3197_v0 }
 0x2a2   : > { %1188 = vmax.xlane.f32.xlu1 %v1187_v48  ;;  %v1190_v53 = vmax.f32 %v2606_v44, %v2611_v51 }
 0x2a4   : > { %1191 = vmax.xlane.f32.xlu0 %v1190_v53 }
 0x2a5   : > { %v2616_v54 = vpop.f32.mrb[48].mxu1 }
 0x2a6   : > { %v920_v56 = vpop.f32.mrb[49].mxu1 }
 0x2a7   : > { %v2618_v58 = vsel %vm1042_vm10, %v920_v56, -1e+30  ;;  %v2620_v59 = vpop.f32.mrb[50].mxu1  ;;  %v2053_v56 = vld [vmem:[%s3192_s1 + $0x58] sm:$0xff]  }
 0x2a8   : > { %v1193_v62 = vmax.f32 %v2616_v54, %v2618_v58  ;;  %v2624_v63 = vpop.f32.mrb[51].mxu1  ;;  %2001 = vmatmul.mubr.msk.bf16.gmra.mrb[40].mxu0 %vm478_vm0, %v2052_v31 }
 0x2a9   : > { %657 = vmatprep.mubr.bf16.mxu0 %v3197_v0 }
 0x2aa   : > { %1194 = vmax.xlane.f32.xlu1 %v1193_v62 }
 0x2ad   : > { %v2626_v3 = vpop.f32.mrb[52].mxu1 }
 0x2ae   : > { %v2628_v6 = vpop.f32.mrb[53].mxu1 }
 0x2af   : > { %v2630_v37 = vpop.f32.mrb[54].mxu1 }
 0x2b0   : > { %v2632_v8 = vpop.f32.mrb[55].mxu1  ;;  %2002 = vmatmul.mubr.msk.bf16.gmra.mrb[44].mxu0 %vm478_vm0, %v2053_v56 }
 0x2b5   : > { %v2634_v10 = vpop.f32.mrb[56].mxu1 }
 0x2b6   : > { %3212 = vst [vmem:[#allocation2_spill] sm:$0xff] %v2634_v10  ;;  %v2636_v11 = vpop.f32.mrb[57].mxu1 }
 0x2b7   : > { %v2638_v14 = vpop.f32.mrb[58].mxu1 }
 0x2b8   : > { %v2640_v18 = vpop.f32.mrb[59].mxu1 }
 0x2bd   : > { %v2642_v19 = vpop.f32.mrb[60].mxu1 }
 0x2be   : > { %3213 = vst [vmem:[#allocation3_spill] sm:$0xff] %v2642_v19  ;;  %v2644_v20 = vpop.f32.mrb[61].mxu1 }
 0x2bf   : > { %v2646_v23 = vpop.f32.mrb[62].mxu1 }
 0x2c0   : > { %v2648_v24 = vpop.f32.mrb[63].mxu1 }
 0x2d6   : > { %v1123_v33 = vpop.xlane.xlu0 %1122 }
 0x2d7   : > { %v1217_v35 = vsub.f32 %v2471_v40, %v1123_v33  ;;  %v1218_v38 = vsub.f32 -1e+30, %v1123_v33 }
 0x2d8   : > { %v1126_v42 = vpop.xlane.xlu1 %1125 }
 0x2d9   : > { %v1281_v47 = vmul.f32 1.442695, %v1217_v35  ;;  %v1283_v48 = vmul.f32 1.442695, %v1218_v38  ;;  %v1219_v49 = vsub.f32 %v2475_v45, %v1126_v42  ;;  %v1220_v53 = vsub.f32 -1e+30, %v1126_v42 }
 0x2da   : > { %v984_v45 = vadd.s32 208, %v2463_v36  ;;  %v983_v38 = vadd.s32 200, %v2463_v36 }
 0x2db   : > { %2058 = vpow2.f32 %v1281_v47  ;;  %v1285_v62 = vmul.f32 1.442695, %v1219_v49  ;;  %v1287_v26 = vmul.f32 1.442695, %v1220_v53 }
 0x2dc   : > { %2060 = vpow2.f32 %v1283_v48  ;;  %vm1046_vm11 = vcmp.le.s32.totalorder %v2548_v61, %v984_v45  ;;  %vm1044_vm12 = vcmp.le.s32.totalorder %v2548_v61, %v983_v38 }
 0x2dd   : > { %2062 = vpow2.f32 %v1285_v62 }
 0x2de   : > { %2064 = vpow2.f32 %v1287_v26  ;;  %v1129_v40 = vpop.xlane.xlu0 %1128  ;;  %v986_v26 = vadd.s32 224, %v2463_v36 }
 0x2df   : > { %v1221_v30 = vsub.f32 %v2481_v50, %v1129_v40  ;;  %v1222_v31 = vsub.f32 -1e+30, %v1129_v40 }
 0x2e0   : > { %vm1050_vm13 = vcmp.le.s32.totalorder %v2548_v61, %v986_v26 }
 0x2e1   : > { %v1289_v33 = vmul.f32 1.442695, %v1221_v30  ;;  %v1291_v35 = vmul.f32 1.442695, %v1222_v31 }
 0x2e2   : > { %v1132_v42 = vpop.xlane.xlu0 %1131 }
 0x2e3   : > { %2066 = vpow2.f32 %v1289_v33  ;;  %v1223_v47 = vsub.f32 %v2485_v55, %v1132_v42  ;;  %v1224_v49 = vsub.f32 -1e+30, %v1132_v42 }
 0x2e4   : > { %2068 = vpow2.f32 %v1291_v35  ;;  %v2690_v35 = vsel %vm1046_vm11, %v2628_v6, -1e+30 }
 0x2e5   : > { %v2675_v48 = vpop.eup %2058  ;;  %v1293_v53 = vmul.f32 1.442695, %v1223_v47  ;;  %v1295_v62 = vmul.f32 1.442695, %v1224_v49 }
 0x2e6   : > { %v2678_v50 = vpop.eup %2060  ;;  %v1135_v56 = vpop.xlane.xlu1 %1134 }
 0x2e7   : > { %v2682_v40 = vpop.eup %2062  ;;  %2070 = vpow2.f32 %v1293_v53  ;;  %v1225_v55 = vsub.f32 %v2491_v60, %v1135_v56  ;;  %v1226_v30 = vsub.f32 -1e+30, %v1135_v56  ;;  %v1409_v31 = vadd.f32 %v2678_v50, %v2675_v48 }
 0x2e8   : > { %v2687_v33 = vpop.eup %2064  ;;  %2072 = vpow2.f32 %v1295_v62  ;;  %v1138_v45 = vpop.xlane.xlu0 %1137  ;;  %v2696_v60 = vsel %vm1044_vm12, %v2624_v63, -1e+30  ;;  %v1199_v56 = vmax.f32 %v2626_v3, %v2690_v35  ;;  %v2707_v63 = vsel %vm1050_vm13, %v2636_v11, -1e+30 }
 0x2e9   : > { %v1297_v42 = vmul.f32 1.442695, %v1225_v55  ;;  %v1299_v47 = vmul.f32 1.442695, %v1226_v30  ;;  %1410 = vadd.xlane.f32.xlu1 %v1409_v31  ;;  %v1227_v49 = vsub.f32 %v2495_v2, %v1138_v45  ;;  %v1228_v0 = vsub.f32 -1e+30, %v1138_v45 }
 0x2ea   : > { %v1412_v53 = vadd.f32 %v2687_v33, %v2682_v40  ;;  %v985_v2 = vadd.s32 216, %v2463_v36  ;;  %3215 = vst [vmem:[#allocation5_spill] sm:$0xff] %v2707_v63  ;;  %v988_v30 = vadd.s32 240, %v2463_v36 }
 0x2eb   : > { %2074 = vpow2.f32 %v1297_v42  ;;  %v1301_v6 = vmul.f32 1.442695, %v1227_v49  ;;  %v1303_v62 = vmul.f32 1.442695, %v1228_v0  ;;  %v1196_v0 = vmax.f32 %v2620_v59, %v2696_v60 }
 0x2ec   : > { %2076 = vpow2.f32 %v1299_v47  ;;  %1413 = vadd.xlane.f32.xlu0 %v1412_v53  ;;  %vm1048_vm14 = vcmp.le.s32.totalorder %v2548_v61, %v985_v2  ;;  %v1205_v47 = vmax.f32 %v2634_v10, %v2707_v63  ;;  %vm1054_vm15 = vcmp.le.s32.totalorder %v2548_v61, %v988_v30 }
 0x2ed   : > { %v2704_v55 = vpop.eup %2066  ;;  %2078 = vpow2.f32 %v1301_v6  ;;  %1200 = vmax.xlane.f32.xlu1 %v1199_v56 }
 0x2ee   : > { %3214 = vst [vmem:[#allocation4_spill] sm:$0xff] %v2704_v55  ;;  %v2709_v38 = vpop.eup %2068  ;;  %2080 = vpow2.f32 %v1303_v62  ;;  %v1141_v26 = vpop.xlane.xlu1 %1140 }
 0x2ef   : > { %v1229_v31 = vsub.f32 %v2501_v7, %v1141_v26  ;;  %v1230_v45 = vsub.f32 -1e+30, %v1141_v26  ;;  %v1415_v42 = vadd.f32 %v2709_v38, %v2704_v55  ;;  %v987_v26 = vadd.s32 232, %v2463_v36 }
 0x2f0   : > { %1197 = vmax.xlane.f32.xlu0 %v1196_v0  ;;  %v1144_v11 = vpop.xlane.xlu0 %1143 }
 0x2f1   : > { %v2720_v49 = vpop.eup %2070  ;;  %v1305_v53 = vmul.f32 1.442695, %v1229_v31  ;;  %v1307_v6 = vmul.f32 1.442695, %v1230_v45  ;;  %1416 = vadd.xlane.f32.xlu1 %v1415_v42  ;;  %v1231_v62 = vsub.f32 %v2505_v12, %v1144_v11  ;;  %v1232_v56 = vsub.f32 -1e+30, %v1144_v11 }
 0x2f2   : > { %v2723_v7 = vpop.eup %2072  ;;  %v2732_v31 = vsel %vm1048_vm14, %v2632_v8, -1e+30  ;;  %v2737_v45 = vsel %vm1054_vm15, %v2644_v20, -1e+30  ;;  %vm1052_vm1 = vcmp.le.s32.totalorder %v2548_v61, %v987_v26 }
 0x2f3   : > { %2082 = vpow2.f32 %v1305_v53  ;;  %v1309_v0 = vmul.f32 1.442695, %v1231_v62  ;;  %v1311_v55 = vmul.f32 1.442695, %v1232_v56  ;;  %v1418_v63 = vadd.f32 %v2723_v7, %v2720_v49  ;;  %3217 = vst [vmem:[#allocation7_spill] sm:$0xff] %v2737_v45 }
 0x2f4   : > { %2084 = vpow2.f32 %v1307_v6  ;;  %v2755_v26 = vsel %vm1052_vm1, %v2640_v18, -1e+30 }
 0x2f5   : > { %v2734_v12 = vpop.eup %2074  ;;  %2086 = vpow2.f32 %v1309_v0  ;;  %1206 = vmax.xlane.f32.xlu1 %v1205_v47  ;;  %1419 = vadd.xlane.f32.xlu0 %v1418_v63  ;;  %v1202_v63 = vmax.f32 %v2630_v37, %v2732_v31  ;;  %v989_v0 = vadd.s32 248, %v2463_v36 }
 0x2f6   : > { %3216 = vst [vmem:[#allocation6_spill] sm:$0xff] %v2734_v12  ;;  %v2739_v30 = vpop.eup %2076  ;;  %2088 = vpow2.f32 %v1311_v55  ;;  %v1147_v42 = vpop.xlane.xlu1 %1146  ;;  %v1211_v55 = vmax.f32 %v2642_v19, %v2737_v45 }
 0x2f7   : > { %v2742_v11 = vpop.eup %2078  ;;  %v1233_v8 = vsub.f32 %v2511_v17, %v1147_v42  ;;  %v1234_v2 = vsub.f32 -1e+30, %v1147_v42  ;;  %v1421_v53 = vadd.f32 %v2739_v30, %v2734_v12  ;;  %vm1056_vm2 = vcmp.le.s32.totalorder %v2548_v61, %v989_v0 }
 0x2f8   : > { %v2749_v47 = vpop.eup %2080  ;;  %v1150_v20 = vpop.xlane.xlu0 %1149 }
 0x2f9   : > { %v1313_v6 = vmul.f32 1.442695, %v1233_v8  ;;  %v1315_v62 = vmul.f32 1.442695, %v1234_v2  ;;  %1422 = vadd.xlane.f32.xlu1 %v1421_v53  ;;  %1203 = vmax.xlane.f32.xlu0 %v1202_v63  ;;  %v1235_v56 = vsub.f32 %v2515_v22, %v1150_v20  ;;  %v1236_v17 = vsub.f32 -1e+30, %v1150_v20 }
 0x2fa   : > { %v1424_v12 = vadd.f32 %v2749_v47, %v2742_v11  ;;  %v1208_v22 = vmax.f32 %v2638_v14, %v2755_v26 }
 0x2fb   : > { %2090 = vpow2.f32 %v1313_v6  ;;  %v1317_v42 = vmul.f32 1.442695, %v1235_v56  ;;  %v1319_v10 = vmul.f32 1.442695, %v1236_v17  ;;  %v2776_v56 = vsel %vm1056_vm2, %v2648_v24, -1e+30 }
 0x2fc   : > { %2092 = vpow2.f32 %v1315_v62  ;;  %v1214_v0 = vmax.f32 %v2646_v23, %v2776_v56 }
 0x2fd   : > { %v2760_v45 = vpop.eup %2082  ;;  %2094 = vpow2.f32 %v1317_v42  ;;  %1212 = vmax.xlane.f32.xlu1 %v1211_v55  ;;  %1425 = vadd.xlane.f32.xlu0 %v1424_v12 }
 0x2fe   : > { %v2764_v8 = vpop.eup %2084  ;;  %2096 = vpow2.f32 %v1319_v10  ;;  %v1153_v18 = vpop.xlane.xlu1 %1152 }
 0x2ff   : > { %v2766_v36 = vpop.eup %2086  ;;  %v1237_v2 = vsub.f32 %v2521_v27, %v1153_v18  ;;  %v1238_v53 = vsub.f32 -1e+30, %v1153_v18  ;;  %v1427_v63 = vadd.f32 %v2764_v8, %v2760_v45 }
 0x300   : > { %v2772_v20 = vpop.eup %2088  ;;  %v1156_v12 = vpop.xlane.xlu0 %1155 }
 0x301   : > { %v1321_v55 = vmul.f32 1.442695, %v1237_v2  ;;  %v1323_v6 = vmul.f32 1.442695, %v1238_v53  ;;  %1428 = vadd.xlane.f32.xlu1 %v1427_v63  ;;  %1209 = vmax.xlane.f32.xlu0 %v1208_v22  ;;  %v1239_v10 = vsub.f32 %v2525_v32, %v1156_v12  ;;  %v1240_v62 = vsub.f32 -1e+30, %v1156_v12 }
 0x302   : > { %v1430_v42 = vadd.f32 %v2772_v20, %v2766_v36 }
 0x303   : > { %2098 = vpow2.f32 %v1321_v55  ;;  %v1325_v27 = vmul.f32 1.442695, %v1239_v10  ;;  %v1327_v17 = vmul.f32 1.442695, %v1240_v62 }
 0x304   : > { %2100 = vpow2.f32 %v1323_v6 }
 0x305   : > { %v2780_v61 = vpop.eup %2090  ;;  %2102 = vpow2.f32 %v1325_v27  ;;  %1431 = vadd.xlane.f32.xlu0 %v1430_v42 }
 0x306   : > { %v2784_v22 = vpop.eup %2092  ;;  %2104 = vpow2.f32 %v1327_v17  ;;  %v1159_v32 = vpop.xlane.xlu1 %1158 }
 0x307   : > { %v2786_v24 = vpop.eup %2094  ;;  %v1241_v18 = vsub.f32 %v2531_v39, %v1159_v32  ;;  %v1242_v2 = vsub.f32 -1e+30, %v1159_v32  ;;  %v1433_v53 = vadd.f32 %v2784_v22, %v2780_v61 }
 0x308   : > { %v2791_v63 = vpop.eup %2096  ;;  %v1162_v12 = vpop.xlane.xlu0 %1161 }
 0x309   : > { %v1329_v55 = vmul.f32 1.442695, %v1241_v18  ;;  %v1331_v6 = vmul.f32 1.442695, %v1242_v2  ;;  %1434 = vadd.xlane.f32.xlu1 %v1433_v53  ;;  %1215 = vmax.xlane.f32.xlu0 %v1214_v0  ;;  %v1243_v10 = vsub.f32 %v2535_v46, %v1162_v12  ;;  %v1244_v62 = vsub.f32 -1e+30, %v1162_v12 }
 0x30a   : > { %v1436_v39 = vadd.f32 %v2791_v63, %v2786_v24 }
 0x30b   : > { %2106 = vpow2.f32 %v1329_v55  ;;  %v1333_v27 = vmul.f32 1.442695, %v1243_v10  ;;  %v1335_v17 = vmul.f32 1.442695, %v1244_v62 }
 0x30c   : > { %2108 = vpow2.f32 %v1331_v6 }
 0x30d   : > { %v2796_v42 = vpop.eup %2098  ;;  %2110 = vpow2.f32 %v1333_v27  ;;  %1437 = vadd.xlane.f32.xlu0 %v1436_v39 }
 0x30e   : > { %3218 = vst [vmem:[#allocation8_spill] sm:$0xff] %v2796_v42  ;;  %v2798_v32 = vpop.eup %2100  ;;  %2112 = vpow2.f32 %v1335_v17  ;;  %v1165_v18 = vpop.xlane.xlu1 %1164 }
 0x30f   : > { %v2800_v2 = vpop.eup %2102  ;;  %v1245_v46 = vsub.f32 %v2541_v52, %v1165_v18  ;;  %v1246_v0 = vsub.f32 -1e+30, %v1165_v18  ;;  %v1439_v53 = vadd.f32 %v2798_v32, %v2796_v42 }
 0x310   : > { %v2805_v12 = vpop.eup %2104  ;;  %v1168_v55 = vpop.xlane.xlu0 %1167 }
 0x311   : > { %v1337_v6 = vmul.f32 1.442695, %v1245_v46  ;;  %v1339_v10 = vmul.f32 1.442695, %v1246_v0  ;;  %1440 = vadd.xlane.f32.xlu1 %v1439_v53  ;;  %v1247_v62 = vsub.f32 %v2544_v57, %v1168_v55  ;;  %v1248_v27 = vsub.f32 -1e+30, %v1168_v55 }
 0x312   : > { %v1442_v17 = vadd.f32 %v2805_v12, %v2800_v2 }
 0x313   : > { %2114 = vpow2.f32 %v1337_v6  ;;  %v1341_v39 = vmul.f32 1.442695, %v1247_v62  ;;  %v1343_v19 = vmul.f32 1.442695, %v1248_v27 }
 0x314   : > { %2116 = vpow2.f32 %v1339_v10  ;;  %1443 = vadd.xlane.f32.xlu0 %v1442_v17 }
 0x315   : > { %v2810_v52 = vpop.eup %2106  ;;  %2118 = vpow2.f32 %v1341_v39 }
 0x316   : > { %3219 = vst [vmem:[#allocation9_spill] sm:$0xff] %v2810_v52  ;;  %v2812_v18 = vpop.eup %2108  ;;  %2120 = vpow2.f32 %v1343_v19 }
 0x317   : > { %3220 = vst [vmem:[#allocation10_spill] sm:$0xff] %v2812_v18  ;;  %v2814_v46 = vpop.eup %2110  ;;  %v1171_v0 = vpop.xlane.xlu1 %1170  ;;  %v1445_v57 = vadd.f32 %v2812_v18, %v2810_v52 }
 0x318   : > { %v2818_v53 = vpop.eup %2112  ;;  %v1249_v55 = vsub.f32 %v2553_v1, %v1171_v0  ;;  %v1250_v6 = vsub.f32 %v2556_v4, %v1171_v0 }
 0x319   : > { %1446 = vadd.xlane.f32.xlu1 %v1445_v57  ;;  %v1174_v10 = vpop.xlane.xlu0 %1173  ;;  %v1448_v62 = vadd.f32 %v2818_v53, %v2814_v46 }
 0x31a   : > { %v1345_v27 = vmul.f32 1.442695, %v1249_v55  ;;  %v1347_v17 = vmul.f32 1.442695, %v1250_v6  ;;  %v1251_v19 = vsub.f32 %v2558_v5, %v1174_v10  ;;  %v1252_v39 = vsub.f32 %v2563_v9, %v1174_v10 }
 0x31b   : > { %1449 = vadd.xlane.f32.xlu0 %v1448_v62 }
 0x31c   : > { %2122 = vpow2.f32 %v1345_v27  ;;  %v1349_v52 = vmul.f32 1.442695, %v1251_v19  ;;  %v1351_v18 = vmul.f32 1.442695, %v1252_v39 }
 0x31d   : > { %v2826_v42 = vpop.eup %2114  ;;  %2124 = vpow2.f32 %v1347_v17 }
 0x31e   : > { %v2828_v1 = vpop.eup %2116  ;;  %2126 = vpow2.f32 %v1349_v52 }
 0x31f   : > { %v2830_v4 = vpop.eup %2118  ;;  %2128 = vpow2.f32 %v1351_v18  ;;  %v1177_v0 = vpop.xlane.xlu1 %1176  ;;  %v1451_v57 = vadd.f32 %v2828_v1, %v2826_v42 }
 0x320   : > { %v2834_v5 = vpop.eup %2120  ;;  %v1253_v9 = vsub.f32 %v2569_v13, %v1177_v0  ;;  %v1254_v55 = vsub.f32 %v2572_v15, %v1177_v0 }
 0x321   : > { %1452 = vadd.xlane.f32.xlu1 %v1451_v57  ;;  %v1180_v6 = vpop.xlane.xlu0 %1179  ;;  %v1454_v10 = vadd.f32 %v2834_v5, %v2830_v4 }
 0x322   : > { %v1353_v62 = vmul.f32 1.442695, %v1253_v9  ;;  %v1355_v52 = vmul.f32 1.442695, %v1254_v55  ;;  %v1255_v27 = vsub.f32 %v2574_v16, %v1180_v6  ;;  %v1256_v18 = vsub.f32 %v2579_v21, %v1180_v6 }
 0x323   : > { %1455 = vadd.xlane.f32.xlu0 %v1454_v10 }
 0x324   : > { %2130 = vpow2.f32 %v1353_v62  ;;  %v1357_v17 = vmul.f32 1.442695, %v1255_v27  ;;  %v1359_v19 = vmul.f32 1.442695, %v1256_v18 }
 0x325   : > { %2132 = vpow2.f32 %v1355_v52 }
 0x326   : > { %v2842_v39 = vpop.eup %2122  ;;  %2134 = vpow2.f32 %v1357_v17 }
 0x327   : > { %v2844_v13 = vpop.eup %2124  ;;  %2136 = vpow2.f32 %v1359_v19  ;;  %v1183_v15 = vpop.xlane.xlu1 %1182 }
 0x328   : > { %v2846_v0 = vpop.eup %2126  ;;  %v1257_v57 = vsub.f32 %v2585_v25, %v1183_v15  ;;  %v1258_v16 = vsub.f32 %v2588_v28, %v1183_v15  ;;  %v1457_v21 = vadd.f32 %v2844_v13, %v2842_v39 }
 0x329   : > { %v2852_v9 = vpop.eup %2128  ;;  %v1186_v55 = vpop.xlane.xlu0 %1185 }
 0x32a   : > { %v1361_v6 = vmul.f32 1.442695, %v1257_v57  ;;  %v1363_v10 = vmul.f32 1.442695, %v1258_v16  ;;  %1458 = vadd.xlane.f32.xlu1 %v1457_v21  ;;  %v1259_v62 = vsub.f32 %v2590_v29, %v1186_v55  ;;  %v1260_v52 = vsub.f32 %v2595_v34, %v1186_v55 }
 0x32b   : > { %v1460_v27 = vadd.f32 %v2852_v9, %v2846_v0 }
 0x32c   : > { %2138 = vpow2.f32 %v1361_v6  ;;  %v1365_v25 = vmul.f32 1.442695, %v1259_v62  ;;  %v1367_v18 = vmul.f32 1.442695, %v1260_v52 }
 0x32d   : > { %2140 = vpow2.f32 %v1363_v10  ;;  %1461 = vadd.xlane.f32.xlu0 %v1460_v27 }
 0x32e   : > { %v2858_v28 = vpop.eup %2130  ;;  %2142 = vpow2.f32 %v1365_v25 }
 0x32f   : > { %v2860_v17 = vpop.eup %2132  ;;  %2144 = vpow2.f32 %v1367_v18  ;;  %v1189_v19 = vpop.xlane.xlu1 %1188 }
 0x330   : > { %v2862_v15 = vpop.eup %2134  ;;  %v1261_v29 = vsub.f32 %v2601_v41, %v1189_v19  ;;  %v1262_v34 = vsub.f32 %v2604_v43, %v1189_v19  ;;  %v1463_v57 = vadd.f32 %v2860_v17, %v2858_v28 }
 0x331   : > { %v2868_v16 = vpop.eup %2136  ;;  %v1192_v21 = vpop.xlane.xlu0 %1191 }
 0x332   : > { %v1369_v55 = vmul.f32 1.442695, %v1261_v29  ;;  %v1371_v6 = vmul.f32 1.442695, %v1262_v34  ;;  %1464 = vadd.xlane.f32.xlu1 %v1463_v57  ;;  %v1263_v10 = vsub.f32 %v2606_v44, %v1192_v21  ;;  %v1264_v62 = vsub.f32 %v2611_v51, %v1192_v21 }
 0x333   : > { %v1466_v52 = vadd.f32 %v2868_v16, %v2862_v15 }
 0x334   : > { %2146 = vpow2.f32 %v1369_v55  ;;  %v1373_v41 = vmul.f32 1.442695, %v1263_v10  ;;  %v1375_v27 = vmul.f32 1.442695, %v1264_v62 }
 0x335   : > { %2148 = vpow2.f32 %v1371_v6  ;;  %1467 = vadd.xlane.f32.xlu0 %v1466_v52 }
 0x336   : > { %v2874_v43 = vpop.eup %2138  ;;  %2150 = vpow2.f32 %v1373_v41 }
 0x337   : > { %v2876_v25 = vpop.eup %2140  ;;  %2152 = vpow2.f32 %v1375_v27  ;;  %v1195_v18 = vpop.xlane.xlu1 %1194 }
 0x338   : > { %v2878_v19 = vpop.eup %2142  ;;  %v1265_v44 = vsub.f32 %v2616_v54, %v1195_v18  ;;  %v1266_v51 = vsub.f32 %v2618_v58, %v1195_v18  ;;  %v1469_v29 = vadd.f32 %v2876_v25, %v2874_v43 }
 0x339   : > { %v2884_v34 = vpop.eup %2144 }
 0x33a   : > { %v1377_v57 = vmul.f32 1.442695, %v1265_v44  ;;  %v1379_v21 = vmul.f32 1.442695, %v1266_v51  ;;  %1470 = vadd.xlane.f32.xlu1 %v1469_v29  ;;  %v1472_v55 = vadd.f32 %v2884_v34, %v2878_v19 }
 0x33c   : > { %2154 = vpow2.f32 %v1377_v57  ;;  %1473 = vadd.xlane.f32.xlu0 %v1472_v55 }
 0x33d   : > { %2156 = vpow2.f32 %v1379_v21 }
 0x33e   : > { %v2888_v6 = vpop.eup %2146 }
 0x33f   : > { %3221 = vst [vmem:[#allocation11_spill] sm:$0xff] %v2888_v6  ;;  %v2890_v10 = vpop.eup %2148 }
 0x340   : > { %v2892_v54 = vpop.eup %2150  ;;  %v1475_v58 = vadd.f32 %v2890_v10, %v2888_v6 }
 0x341   : > { %3222 = vst [vmem:[#allocation12_spill] sm:$0xff] %v2892_v54  ;;  %v2896_v62 = vpop.eup %2152 }
 0x342   : > { %3223 = vst [vmem:[#allocation13_spill] sm:$0xff] %v2896_v62  ;;  %1476 = vadd.xlane.f32.xlu1 %v1475_v58  ;;  %v1478_v52 = vadd.f32 %v2896_v62, %v2892_v54 }
 0x344   : > { %1479 = vadd.xlane.f32.xlu0 %v1478_v52 }
 0x346   : > { %v2900_v41 = vpop.eup %2154 }
 0x347   : > { %3224 = vst [vmem:[#allocation14_spill] sm:$0xff] %v2900_v41  ;;  %v2902_v27 = vpop.eup %2156 }
 0x348   : > { %v1481_v18 = vadd.f32 %v2902_v27, %v2900_v41 }
 0x34a   : > { %1482 = vadd.xlane.f32.xlu1 %v1481_v18 }
 0x376   : > { %v1411_v44 = vpop.xlane.xlu1 %1410 }
 0x377   : > { %2158 = vrcp.f32 %v1411_v44 }
 0x379   : > { %v1414_v51 = vpop.xlane.xlu0 %1413 }
 0x37a   : > { %2160 = vrcp.f32 %v1414_v51  ;;  %v1201_v29 = vpop.xlane.xlu1 %1200 }
 0x37b   : > { %v1269_v57 = vsub.f32 %v2626_v3, %v1201_v29  ;;  %v1270_v21 = vsub.f32 %v2690_v35, %v1201_v29 }
 0x37d   : > { %v1385_v55 = vmul.f32 1.442695, %v1269_v57  ;;  %v1387_v58 = vmul.f32 1.442695, %v1270_v21  ;;  %v1198_v52 = vpop.xlane.xlu0 %1197 }
 0x37e   : > { %v1267_v6 = vsub.f32 %v2620_v59, %v1198_v52  ;;  %v1268_v54 = vsub.f32 %v2696_v60, %v1198_v52  ;;  %v1417_v62 = vpop.xlane.xlu1 %1416 }
 0x37f   : > { %2162 = vpow2.f32 %v1385_v55 }
 0x380   : > { %2164 = vpow2.f32 %v1387_v58  ;;  %v1381_v18 = vmul.f32 1.442695, %v1267_v6  ;;  %v1383_v41 = vmul.f32 1.442695, %v1268_v54 }
 0x381   : > { %2166 = vrcp.f32 %v1417_v62  ;;  %v2159_v44 = vpop.eup %2158 }
 0x382   : > { %2168 = vpow2.f32 %v1381_v18  ;;  %v2910_v51 = vpop.xlane.xlu1 %1206  ;;  %v1420_v3 = vpop.xlane.xlu0 %1419  ;;  %v1538_v29 = vmul.f32 %v2159_v44, %v2678_v50  ;;  %v1537_v6 = vmul.f32 %v2159_v44, %v2675_v48 }
 0x383   : > { %2170 = vpow2.f32 %v1383_v41 }
 0x384   : > { %v2161_v35 = vpop.eup %2160  ;;  %2172 = vrcp.f32 %v1420_v3 }
 0x385   : > { %v1540_v59 = vmul.f32 %v2161_v35, %v2687_v33  ;;  %v1539_v60 = vmul.f32 %v2161_v35, %v2682_v40 }
 0x386   : > { %v1423_v57 = vpop.xlane.xlu1 %1422  ;;  %v1204_v21 = vpop.xlane.xlu0 %1203 }
 0x387   : > { %v1271_v54 = vsub.f32 %v2630_v37, %v1204_v21  ;;  %v1272_v62 = vsub.f32 %v2732_v31, %v1204_v21  ;;  %v1610_v55 = vpack.c.bf16 %v1540_v59, %v1538_v29  ;;  %v1609_v58 = vpack.c.bf16 %v1539_v60, %v1537_v6 }
 0x388   : > { %2174 = vrcp.f32 %v1423_v57 }
 0x389   : > { %v2918_v52 = vpop.eup %2162  ;;  %v1389_v41 = vmul.f32 1.442695, %v1271_v54  ;;  %v1391_v18 = vmul.f32 1.442695, %v1272_v62  ;;  %1641 = vmatprep.subr.bf16.mxu0 %v1610_v55  ;;  %v3225_v54 = vld [vmem:[#allocation4_spill] sm:$0xff] }
 0x38a   : > { %v2920_v50 = vpop.eup %2164  ;;  %1642 = vmatpush1.bf16.xpose.msra.mxu0 %v1609_v58  ;;  %v2922_v40 = vpop.xlane.xlu1 %1212 }
 0x38b   : > { %v1426_v33 = vpop.xlane.xlu0 %1425  ;;  %v2167_v3 = vpop.eup %2166  ;;  %2176 = vpow2.f32 %v1389_v41  ;;  %v1487_v37 = vadd.f32 %v2920_v50, %v2918_v52 }
 0x38c   : > { %v2926_v48 = vpop.eup %2168  ;;  %2178 = vpow2.f32 %v1391_v18  ;;  %v1542_v21 = vmul.f32 %v2167_v3, %v2709_v38  ;;  %v1541_v62 = vmul.f32 %v2167_v3, %v3225_v54 }
 0x38d   : > { %v2928_v31 = vpop.eup %2170  ;;  %2180 = vrcp.f32 %v1426_v33  ;;  %1488 = vadd.xlane.f32.xlu1 %v1487_v37 }
 0x38e   : > { %v2173_v44 = vpop.eup %2172  ;;  %v1484_v35 = vadd.f32 %v2928_v31, %v2926_v48  ;;  %v1429_v59 = vpop.xlane.xlu1 %1428 }
 0x38f   : > { %v1210_v29 = vpop.xlane.xlu0 %1209  ;;  %v1544_v6 = vmul.f32 %v2173_v44, %v2723_v7  ;;  %v1543_v55 = vmul.f32 %v2173_v44, %v2720_v49  ;;  %2182 = vrcp.f32 %v1429_v59 }
 0x390   : > { %v1275_v60 = vsub.f32 %v2638_v14, %v1210_v29  ;;  %v1276_v57 = vsub.f32 %v2755_v26, %v1210_v29  ;;  %1485 = vadd.xlane.f32.xlu0 %v1484_v35 }
 0x391   : > { %v1612_v18 = vpack.c.bf16 %v1544_v6, %v1542_v21  ;;  %v1611_v37 = vpack.c.bf16 %v1543_v55, %v1541_v62 }
 0x392   : > { %v1397_v58 = vmul.f32 1.442695, %v1275_v60  ;;  %v1399_v41 = vmul.f32 1.442695, %v1276_v57  ;;  %v2175_v14 = vpop.eup %2174  ;;  %v3226_v57 = vld [vmem:[#allocation6_spill] sm:$0xff] }
 0x393   : > { %v1432_v33 = vpop.xlane.xlu0 %1431  ;;  %1643 = vmatprep.subr.bf16.mxu0 %v1612_v18  ;;  %v1546_v59 = vmul.f32 %v2175_v14, %v2739_v30  ;;  %v1545_v21 = vmul.f32 %v2175_v14, %v3226_v57  ;;  %v2957_v18 = vpop.f32.mrb[32].mxu0 }
 0x394   : > { %2184 = vpow2.f32 %v1397_v58  ;;  %1644 = vmatpush1.bf16.xpose.msra.mxu0 %v1611_v37 }
 0x395   : > { %2186 = vpow2.f32 %v1399_v41  ;;  %v2938_v26 = vpop.eup %2176 }
 0x396   : > { %2188 = vrcp.f32 %v1432_v33  ;;  %v2940_v38 = vpop.eup %2178  ;;  %v1435_v35 = vpop.xlane.xlu1 %1434 }
 0x397   : > { %v1216_v7 = vpop.xlane.xlu0 %1215  ;;  %v2181_v3 = vpop.eup %2180  ;;  %v1490_v29 = vadd.f32 %v2940_v38, %v2938_v26  ;;  %2190 = vrcp.f32 %v1435_v35 }
 0x398   : > { %v1279_v49 = vsub.f32 %v2646_v23, %v1216_v7  ;;  %v1280_v44 = vsub.f32 %v2776_v56, %v1216_v7  ;;  %v1548_v60 = vmul.f32 %v2181_v3, %v2749_v47  ;;  %v1547_v6 = vmul.f32 %v2181_v3, %v2742_v11  ;;  %v290_v56 = vld [vmem:[%s3193_s2 + $0x80] sm:$0xff]  ;;  %v2962_v7 = vpop.f32.mrb[33].mxu0 }
 0x399   : > { %1491 = vadd.xlane.f32.xlu0 %v1490_v29  ;;  %v2183_v41 = vpop.eup %2182 }
 0x39a   : > { %v1405_v54 = vmul.f32 1.442695, %v1279_v49  ;;  %v1407_v62 = vmul.f32 1.442695, %v1280_v44  ;;  %v1614_v55 = vpack.c.bf16 %v1548_v60, %v1546_v59  ;;  %v1613_v23 = vpack.c.bf16 %v1547_v6, %v1545_v21 }
 0x39b   : > { %v1438_v58 = vpop.xlane.xlu0 %1437  ;;  %v1550_v14 = vmul.f32 %v2183_v41, %v2764_v8  ;;  %v1549_v35 = vmul.f32 %v2183_v41, %v2760_v45  ;;  %v3228_v41 = vld [vmem:[#allocation5_spill] sm:$0xff] }
 0x39c   : > { %2192 = vpow2.f32 %v1405_v54  ;;  %1645 = vmatprep.subr.bf16.mxu0 %v1614_v55 }
 0x39d   : > { %2194 = vpow2.f32 %v1407_v62  ;;  %1646 = vmatpush1.bf16.xpose.msra.mxu0 %v1613_v23  ;;  %v3227_v23 = vld [vmem:[#allocation2_spill] sm:$0xff] }
 0x39e   : > { %v2953_v30 = vpop.eup %2184  ;;  %2196 = vrcp.f32 %v1438_v58  ;;  %380 = vperm.xlu1 %2041, %v290_v56   ;;  %v1441_v47 = vpop.xlane.xlu1 %1440  ;;  %v1273_v56 = vsub.f32 %v3227_v23, %v2910_v51 }
 0x39f   : > { %v2955_v11 = vpop.eup %2186  ;;  %2198 = vrcp.f32 %v1441_v47  ;;  %v1274_v47 = vsub.f32 %v3228_v41, %v2910_v51 }
 0x3a0   : > { %v2189_v33 = vpop.eup %2188  ;;  %v1496_v37 = vadd.f32 %v2955_v11, %v2953_v30 }
 0x3a1   : > { %v1552_v3 = vmul.f32 %v2189_v33, %v2772_v20  ;;  %v1551_v49 = vmul.f32 %v2189_v33, %v2766_v36  ;;  %v1444_v44 = vpop.xlane.xlu0 %1443  ;;  %v2191_v60 = vpop.eup %2190 }
 0x3a2   : > { %1497 = vadd.xlane.f32.xlu0 %v1496_v37  ;;  %2200 = vrcp.f32 %v1444_v44  ;;  %v1554_v36 = vmul.f32 %v2191_v60, %v2784_v22  ;;  %v1553_v62 = vmul.f32 %v2191_v60, %v2780_v61  ;;  %v3230_v44 = vld [vmem:[#allocation7_spill] sm:$0xff] }
 0x3a3   : > { %v1616_v29 = vpack.c.bf16 %v1552_v3, %v1550_v14  ;;  %v1615_v59 = vpack.c.bf16 %v1551_v49, %v1549_v35  ;;  %v3229_v3 = vld [vmem:[#allocation3_spill] sm:$0xff] }
 0x3a4   : > { %v1277_v35 = vsub.f32 %v3229_v3, %v2922_v40 }
 0x3a5   : > { %1647 = vmatprep.subr.bf16.mxu0 %v1616_v29  ;;  %v1278_v29 = vsub.f32 %v3230_v44, %v2922_v40 }
 0x3a6   : > { %v2967_v57 = vpop.eup %2192  ;;  %1648 = vmatpush1.bf16.xpose.msra.mxu0 %v1615_v59  ;;  %v1447_v21 = vpop.xlane.xlu1 %1446 }
 0x3a7   : > { %v2969_v8 = vpop.eup %2194  ;;  %2202 = vrcp.f32 %v1447_v21 }
 0x3a8   : > { %v2197_v6 = vpop.eup %2196  ;;  %v1502_v45 = vadd.f32 %v2969_v8, %v2967_v57  ;;  %v1450_v20 = vpop.xlane.xlu0 %1449 }
 0x3a9   : > { %v1556_v54 = vmul.f32 %v2197_v6, %v2791_v63  ;;  %v1555_v55 = vmul.f32 %v2197_v6, %v2786_v24  ;;  %2204 = vrcp.f32 %v1450_v20  ;;  %v2199_v58 = vpop.eup %2198  ;;  %v1393_v63 = vmul.f32 1.442695, %v1273_v56  ;;  %v2992_v56 = vpop.f32.mrb[34].mxu0 }
 0x3aa   : > { %1503 = vadd.xlane.f32.xlu0 %v1502_v45  ;;  %v1558_v22 = vmul.f32 %v2199_v58, %v2798_v32  ;;  %v1395_v24 = vmul.f32 1.442695, %v1274_v47  ;;  %v3231_v32 = vld [vmem:[#allocation8_spill] sm:$0xff]  ;;  %v1403_v20 = vmul.f32 1.442695, %v1278_v29  ;;  %v3233_v47 = vld [vmem:[#allocation9_spill] sm:$0xff] }
 0x3ab   : > { %v1618_v33 = vpack.c.bf16 %v1556_v54, %v1554_v36  ;;  %v1617_v37 = vpack.c.bf16 %v1555_v55, %v1553_v62  ;;  %v1557_v6 = vmul.f32 %v2199_v58, %v3231_v32  ;;  %v3232_v54 = vld [vmem:[#allocation10_spill] sm:$0xff]  ;;  %v2994_v58 = vpop.f32.mrb[35].mxu0 }
 0x3ac   : > { %v2201_v14 = vpop.eup %2200 }
 0x3ad   : > { %1649 = vmatprep.subr.bf16.mxu0 %v1618_v33  ;;  %v1560_v61 = vmul.f32 %v2201_v14, %v2805_v12  ;;  %v1559_v59 = vmul.f32 %v2201_v14, %v2800_v2  ;;  %v1401_v12 = vmul.f32 1.442695, %v1277_v35 }
 0x3ae   : > { %1650 = vmatpush1.bf16.xpose.msra.mxu0 %v1617_v37  ;;  %v1453_v49 = vpop.xlane.xlu1 %1452  ;;  %v2997_v37 = vpop.f32.mrb[36].mxu0 }
 0x3af   : > { %2206 = vrcp.f32 %v1453_v49  ;;  %v1620_v51 = vpack.c.bf16 %v1560_v61, %v1558_v22  ;;  %v1619_v36 = vpack.c.bf16 %v1559_v59, %v1557_v6 }
 0x3b0   : > { %v1456_v60 = vpop.xlane.xlu0 %1455 }
 0x3b1   : > { %v2203_v21 = vpop.eup %2202  ;;  %1651 = vmatprep.subr.bf16.mxu0 %v1620_v51  ;;  %2208 = vrcp.f32 %v1456_v60 }
 0x3b2   : > { %2210 = vpow2.f32 %v1393_v63  ;;  %v1562_v62 = vmul.f32 %v2203_v21, %v3232_v54  ;;  %v1561_v33 = vmul.f32 %v2203_v21, %v3233_v47  ;;  %v296_v54 = vld [vmem:[%s3193_s2 + $0xb0] sm:$0xff] }
 0x3b3   : > { %v2205_v45 = vpop.eup %2204  ;;  %2212 = vpow2.f32 %v1395_v24 }
 0x3b4   : > { %v1564_v40 = vmul.f32 %v2205_v45, %v2818_v53  ;;  %2214 = vpow2.f32 %v1401_v12  ;;  %v1563_v23 = vmul.f32 %v2205_v45, %v2814_v46  ;;  %v2999_v53 = vpop.f32.mrb[37].mxu0  ;;  %v291_v46 = vld [vmem:[%s3193_s2 + $0x88] sm:$0xff] }
 0x3b5   : > { %2216 = vpow2.f32 %v1403_v20  ;;  %v3018_v60 = vpop.f32.mrb[38].mxu0 }
 0x3b6   : > { %1652 = vmatpush1.bf16.xpose.msra.mxu0 %v1619_v36  ;;  %v1622_v55 = vpack.c.bf16 %v1564_v40, %v1562_v62  ;;  %v1621_v61 = vpack.c.bf16 %v1563_v23, %v1561_v33  ;;  %v3023_v32 = vpop.f32.mrb[39].mxu0 }
 0x3b7   : > { %v1459_v2 = vpop.xlane.xlu1 %1458  ;;  %v3025_v6 = vpop.f32.mrb[40].mxu0 }
 0x3b8   : > { %1653 = vmatprep.subr.bf16.mxu0 %v1622_v55  ;;  %2218 = vrcp.f32 %v1459_v2  ;;  %v3027_v20 = vpop.f32.mrb[41].mxu0 }
 0x3b9   : > { %v2207_v41 = vpop.eup %2206 }
 0x3ba   : > { %v1462_v14 = vpop.xlane.xlu0 %1461  ;;  %v1566_v24 = vmul.f32 %v2207_v41, %v2828_v1  ;;  %v294_v1 = vld [vmem:[%s3193_s2 + $0xa0] sm:$0xff]  ;;  %v1565_v21 = vmul.f32 %v2207_v41, %v2826_v42  ;;  %v3034_v42 = vpop.f32.mrb[42].mxu0 }
 0x3bb   : > { %v2209_v22 = vpop.eup %2208  ;;  %2220 = vrcp.f32 %v1462_v14  ;;  %v3036_v40 = vpop.f32.mrb[43].mxu0 }
 0x3bc   : > { %v3001_v63 = vpop.eup %2210  ;;  %v1568_v3 = vmul.f32 %v2209_v22, %v2834_v5  ;;  %v1567_v29 = vmul.f32 %v2209_v22, %v2830_v4  ;;  %v3040_v23 = vpop.f32.mrb[44].mxu0  ;;  %v1730_v22 = vld [vmem:[%s3195_s4] sm:$0xff] }
 0x3bd   : > { %v3008_v35 = vpop.eup %2212  ;;  %v3043_v33 = vpop.f32.mrb[45].mxu0 }
 0x3be   : > { %1654 = vmatpush1.bf16.xpose.msra.mxu0 %v1621_v61  ;;  %v1624_v49 = vpack.c.bf16 %v1568_v3, %v1566_v24  ;;  %v3011_v51 = vpop.eup %2214  ;;  %v1493_v59 = vadd.f32 %v3008_v35, %v3001_v63  ;;  %v1623_v45 = vpack.c.bf16 %v1567_v29, %v1565_v21 }
 0x3bf   : > { %v1465_v44 = vpop.xlane.xlu1 %1464  ;;  %v3020_v5 = vpop.eup %2216 }
 0x3c0   : > { %385 = vperm.xlu0 %2040, %v291_v46   ;;  %1655 = vmatprep.subr.bf16.mxu0 %v1624_v49  ;;  %2222 = vrcp.f32 %v1465_v44  ;;  %v1499_v36 = vadd.f32 %v3020_v5, %v3011_v51 }
 0x3c2   : > { %1494 = vadd.xlane.f32.xlu1 %v1493_v59  ;;  %v1468_v4 = vpop.xlane.xlu0 %1467  ;;  %v2219_v12 = vpop.eup %2218  ;;  %v1734_v59 = vld [vmem:[%s3195_s4 + $0x20] sm:$0xff] }
 0x3c3   : > { %2224 = vrcp.f32 %v1468_v4  ;;  %v1570_v55 = vmul.f32 %v2219_v12, %v2844_v13  ;;  %v1569_v46 = vmul.f32 %v2219_v12, %v2842_v39 }
 0x3c4   : > { %400 = vperm.xlu0 %2040, %v294_v1  }
 0x3c5   : > { %v2221_v62 = vpop.eup %2220 }
 0x3c6   : > { %1656 = vmatpush1.bf16.xpose.msra.mxu0 %v1623_v45  ;;  %1500 = vadd.xlane.f32.xlu1 %v1499_v36  ;;  %v1572_v2 = vmul.f32 %v2221_v62, %v2852_v9  ;;  %v1571_v47 = vmul.f32 %v2221_v62, %v2846_v0  ;;  %v1732_v0 = vld [vmem:[%s3195_s4 + $0x10] sm:$0xff]  ;;  %v293_v62 = vld [vmem:[%s3193_s2 + $0x98] sm:$0xff] }
 0x3c7   : > { %v1471_v41 = vpop.xlane.xlu1 %1470 }
 0x3c8   : > { %410 = vperm.xlu0 %2040, %v296_v54   ;;  %2226 = vrcp.f32 %v1471_v41  ;;  %v1626_v14 = vpack.c.bf16 %v1572_v2, %v1570_v55  ;;  %v1625_v9 = vpack.c.bf16 %v1571_v47, %v1569_v46 }
 0x3c9   : > { %v1474_v61 = vpop.xlane.xlu0 %1473 }
 0x3ca   : > { %1657 = vmatprep.subr.bf16.mxu0 %v1626_v14  ;;  %2228 = vrcp.f32 %v1474_v61  ;;  %v2223_v13 = vpop.eup %2222  ;;  %v3234_v14 = vld [vmem:[#allocation13_spill] sm:$0xff]  ;;  %v3235_v61 = vld [vmem:[#allocation12_spill] sm:$0xff] }
 0x3cb   : > { %v1574_v3 = vmul.f32 %v2223_v13, %v2860_v17  ;;  %v1573_v21 = vmul.f32 %v2223_v13, %v2858_v28  ;;  %v3236_v13 = vld [vmem:[#allocation11_spill] sm:$0xff] }
 0x3cc   : > { %1740 = vperm.xlu0 %2040, %v1730_v22  }
 0x3cd   : > { %v2225_v24 = vpop.eup %2224 }
 0x3ce   : > { %1658 = vmatpush1.bf16.xpose.msra.mxu0 %v1625_v9  ;;  %v1576_v49 = vmul.f32 %v2225_v24, %v2868_v16  ;;  %v1575_v29 = vmul.f32 %v2225_v24, %v2862_v15  ;;  %v292_v16 = vld [vmem:[%s3193_s2 + $0x90] sm:$0xff] }
 0x3cf   : > { %v1477_v44 = vpop.xlane.xlu1 %1476  ;;  %v1736_v15 = vld [vmem:[%s3195_s4 + $0x30] sm:$0xff] }
 0x3d0   : > { %1750 = vperm.xlu0 %2040, %v1732_v0   ;;  %2230 = vrcp.f32 %v1477_v44  ;;  %v1628_v39 = vpack.c.bf16 %v1576_v49, %v1574_v3  ;;  %v1627_v17 = vpack.c.bf16 %v1575_v29, %v1573_v21  ;;  %v3082_v0 = vpop.f32.mrb[46].mxu0  ;;  %v1733_v49 = vld [vmem:[%s3195_s4 + $0x18] sm:$0xff]  ;;  %v1735_v44 = vld [vmem:[%s3195_s4 + $0x28] sm:$0xff] }
 0x3d1   : > { %v1480_v1 = vpop.xlane.xlu0 %1479  ;;  %v3084_v3 = vpop.f32.mrb[47].mxu0  ;;  %v1737_v29 = vld [vmem:[%s3195_s4 + $0x38] sm:$0xff] }
 0x3d2   : > { %v2227_v4 = vpop.eup %2226  ;;  %1659 = vmatprep.subr.bf16.mxu0 %v1628_v39  ;;  %2232 = vrcp.f32 %v1480_v1 }
 0x3d3   : > { %v1578_v45 = vmul.f32 %v2227_v4, %v2876_v25  ;;  %v1577_v55 = vmul.f32 %v2227_v4, %v2874_v43  ;;  %v295_v25 = vld [vmem:[%s3193_s2 + $0xa8] sm:$0xff]  ;;  %v297_v43 = vld [vmem:[%s3193_s2 + $0xb8] sm:$0xff] }
 0x3d4   : > { %1760 = vperm.xlu0 %2040, %v1734_v59   ;;  %v2229_v12 = vpop.eup %2228 }
 0x3d5   : > { %v1580_v36 = vmul.f32 %v2229_v12, %v2884_v34  ;;  %v1579_v54 = vmul.f32 %v2229_v12, %v2878_v19 }
 0x3d6   : > { %1660 = vmatpush1.bf16.xpose.msra.mxu0 %v1627_v17 }
 0x3d7   : > { %390 = vperm.xlu1 %2041, %v292_v16   ;;  %v1630_v28 = vpack.c.bf16 %v1580_v36, %v1578_v45  ;;  %v1629_v41 = vpack.c.bf16 %v1579_v54, %v1577_v55  ;;  %v1483_v39 = vpop.xlane.xlu1 %1482 }
 0x3d8   : > { %1770 = vperm.xlu0 %2040, %v1736_v15   ;;  %2234 = vrcp.f32 %v1483_v39  ;;  %v3237_v15 = vld [vmem:[#allocation14_spill] sm:$0xff] }
 0x3d9   : > { %1661 = vmatprep.subr.bf16.mxu0 %v1630_v28 }
 0x3da   : > { %v2231_v2 = vpop.eup %2230 }
 0x3db   : > { %395 = vperm.xlu1 %2041, %v293_v62   ;;  %v1582_v34 = vmul.f32 %v2231_v2, %v2890_v10  ;;  %v1581_v9 = vmul.f32 %v2231_v2, %v3236_v13  ;;  %v1731_v10 = vld [vmem:[%s3195_s4 + $0x8] sm:$0xff] }
 0x3dc   : > { %v2233_v47 = vpop.eup %2232 }
 0x3dd   : > { %v1584_v19 = vmul.f32 %v2233_v47, %v3234_v14  ;;  %v1583_v46 = vmul.f32 %v2233_v47, %v3235_v61 }
 0x3de   : > { %1662 = vmatpush1.bf16.xpose.msra.mxu0 %v1629_v41 }
 0x3df   : > { %405 = vperm.xlu1 %2041, %v295_v25   ;;  %v1632_v22 = vpack.c.bf16 %v1584_v19, %v1582_v34  ;;  %v1631_v24 = vpack.c.bf16 %v1583_v46, %v1581_v9 }
 0x3e1   : > { %1663 = vmatprep.subr.bf16.mxu0 %v1632_v22 }
 0x3e2   : > { %v2235_v21 = vpop.eup %2234 }
 0x3e3   : > { %415 = vperm.xlu1 %2041, %v297_v43   ;;  %v1586_v12 = vmul.f32 %v2235_v21, %v2902_v27  ;;  %v1585_v45 = vmul.f32 %v2235_v21, %v3237_v15 }
 0x3e6   : > { %1664 = vmatpush1.bf16.xpose.msra.mxu0 %v1631_v24 }
 0x3e7   : > { %1745 = vperm.xlu1 %2041, %v1731_v10  }
 0x3eb   : > { %1755 = vperm.xlu1 %2041, %v1733_v49  }
 0x3ef   : > { %1765 = vperm.xlu1 %2041, %v1735_v44  }
 0x3f3   : > { %1775 = vperm.xlu1 %2041, %v1737_v29  }
 0x41a   : > { %v1489_v1 = vpop.xlane.xlu1 %1488 }
 0x41d   : > { %v1486_v59 = vpop.xlane.xlu0 %1485 }
 0x41e   : > { %2236 = vrcp.f32 %v1486_v59  ;;  %v381_v14 = vpop.permute.xlu1 %380 }
 0x41f   : > { %2238 = vrcp.f32 %v1489_v1  ;;  %v630_v22 = vadd.f32 %v2957_v18, %v381_v14  ;;  %v632_v61 = vadd.f32 %v2962_v7, %v381_v14 }
 0x426   : > { %v1492_v4 = vpop.xlane.xlu0 %1491 }
 0x427   : > { %2240 = vrcp.f32 %v1492_v4 }
 0x428   : > { %v2237_v17 = vpop.eup %2236 }
 0x429   : > { %v1588_v16 = vmul.f32 %v2237_v17, %v2928_v31  ;;  %v1587_v36 = vmul.f32 %v2237_v17, %v2926_v48  ;;  %v2239_v62 = vpop.eup %2238 }
 0x42a   : > { %v1590_v2 = vmul.f32 %v2239_v62, %v2920_v50  ;;  %v1589_v47 = vmul.f32 %v2239_v62, %v2918_v52 }
 0x42b   : > { %v1634_v28 = vpack.c.bf16 %v1588_v16, %v1586_v12  ;;  %v1633_v54 = vpack.c.bf16 %v1587_v36, %v1585_v45 }
 0x42d   : > { %1665 = vmatprep.subr.bf16.mxu0 %v1634_v28 }
 0x42e   : > { %1666 = vmatpush1.bf16.xpose.msra.mxu0 %v1633_v54 }
 0x42f   : > { %v1498_v34 = vpop.xlane.xlu0 %1497 }
 0x430   : > { %2242 = vrcp.f32 %v1498_v34 }
 0x431   : > { %v2241_v55 = vpop.eup %2240 }
 0x432   : > { %v1592_v41 = vmul.f32 %v2241_v55, %v2940_v38  ;;  %v1591_v27 = vmul.f32 %v2241_v55, %v2938_v26 }
 0x434   : > { %v1636_v25 = vpack.c.bf16 %v1592_v41, %v1590_v2  ;;  %v1635_v31 = vpack.c.bf16 %v1591_v27, %v1589_v47 }
 0x436   : > { %1667 = vmatprep.subr.bf16.mxu0 %v1636_v25 }
 0x437   : > { %1668 = vmatpush1.bf16.xpose.msra.mxu0 %v1635_v31  ;;  %v1504_v48 = vpop.xlane.xlu0 %1503 }
 0x43a   : > { %v2243_v9 = vpop.eup %2242 }
 0x43b   : > { %v1595_v49 = vmul.f32 %v2243_v9, %v2953_v30 }
 0x43f   : > { %v386_v19 = vpop.permute.xlu0 %385 }
 0x440   : > { %v634_v50 = vadd.f32 %v2992_v56, %v386_v19  ;;  %v636_v38 = vadd.f32 %v2994_v58, %v386_v19  ;;  %v1596_v56 = vmul.f32 %v2243_v9, %v2955_v11  ;;  %v3238_v9 = vmov 0  }
 0x442   : > { %v1601_v46 = vpack.c.bf16 %v634_v50, %v630_v22  ;;  %v1602_v52 = vpack.c.bf16 %v636_v38, %v632_v61 }
 0x443   : > { %v401_v10 = vpop.permute.xlu0 %400 }
 0x444   : > { %1673 = vmatprep.mubr.bf16.mxu0 %v1602_v52 }
 0x44f   : > { %v1495_v26 = vpop.xlane.xlu1 %1494 }
 0x450   : > { %2244 = vrcp.f32 %v1495_v26 }
 0x451   : > { %2246 = vrcp.f32 %v1504_v48 }
 0x453   : > { %v1501_v43 = vpop.xlane.xlu1 %1500 }
 0x454   : > { %2248 = vrcp.f32 %v1501_v43 }
 0x457   : > { %v391_v13 = vpop.permute.xlu1 %390 }
 0x458   : > { %v640_v29 = vadd.f32 %v2997_v37, %v391_v13  ;;  %v642_v39 = vadd.f32 %v2999_v53, %v391_v13  ;;  %v652_v37 = vadd.f32 %v3027_v20, %v401_v10  ;;  %v2054_v13 = vld [vmem:[%s3194_s3] sm:$0xff]  }
 0x45a   : > { %v2245_v24 = vpop.eup %2244 }
 0x45b   : > { %v396_v18 = vpop.permute.xlu1 %395  ;;  %v1594_v7 = vmul.f32 %v2245_v24, %v3008_v35  ;;  %v1593_v58 = vmul.f32 %v2245_v24, %v3001_v63  ;;  %v2247_v44 = vpop.eup %2246  ;;  %v650_v63 = vadd.f32 %v3025_v6, %v401_v10  ;;  %v2055_v24 = vld [vmem:[%s3194_s3 + $0x8] sm:$0xff]   ;;  %v2056_v10 = vld [vmem:[%s3194_s3 + $0x10] sm:$0xff]  }
 0x45c   : > { %v644_v59 = vadd.f32 %v3018_v60, %v396_v18  ;;  %v646_v1 = vadd.f32 %v3023_v32, %v396_v18  ;;  %v1600_v30 = vmul.f32 %v2247_v44, %v2969_v8  ;;  %v411_v32 = vpop.permute.xlu0 %410  ;;  %v2057_v18 = vld [vmem:[%s3194_s3 + $0x18] sm:$0xff]  }
 0x45d   : > { %v1638_v21 = vpack.c.bf16 %v1596_v56, %v1594_v7  ;;  %v1637_v4 = vpack.c.bf16 %v1595_v49, %v1593_v58  ;;  %v660_v8 = vadd.f32 %v3040_v23, %v411_v32  ;;  %v662_v6 = vadd.f32 %v3043_v33, %v411_v32 }
 0x45e   : > { %v2249_v17 = vpop.eup %2248  ;;  %v1603_v12 = vpack.c.bf16 %v644_v59, %v640_v29  ;;  %v1604_v35 = vpack.c.bf16 %v646_v1, %v642_v39  ;;  %v2250_v59 = vld [vmem:[%s2325_s23] sm:$0xff] }
 0x45f   : > { %v406_v16 = vpop.permute.xlu1 %405  ;;  %1669 = vmatprep.subr.bf16.mxu0 %v1638_v21  ;;  %v1598_v11 = vmul.f32 %v2249_v17, %v3020_v5  ;;  %v1597_v28 = vmul.f32 %v2249_v17, %v3011_v51  ;;  %v1599_v5 = vmul.f32 %v2247_v44, %v2967_v57  ;;  %v2251_v17 = vld [vmem:[%s2325_s23 + $0x8] sm:$0xff] }
 0x460   : > { %v654_v53 = vadd.f32 %v3034_v42, %v406_v16  ;;  %v656_v60 = vadd.f32 %v3036_v40, %v406_v16  ;;  %1670 = vmatpush1.bf16.xpose.msra.mxu0 %v1637_v4  ;;  %v1741_v7 = vpop.permute.xlu0 %1740  ;;  %v2252_v16 = vld [vmem:[%s2325_s23 + $0x10] sm:$0xff] }
 0x461   : > { %v1640_v15 = vpack.c.bf16 %v1600_v30, %v1598_v11  ;;  %v1639_v55 = vpack.c.bf16 %v1599_v5, %v1597_v28  ;;  %v2253_v30 = vld [vmem:[%s2325_s23 + $0x18] sm:$0xff]  ;;  %v2254_v28 = vld [vmem:[%s2325_s23 + $0x20] sm:$0xff] }
 0x462   : > { %v1605_v45 = vpack.c.bf16 %v654_v53, %v650_v63  ;;  %v1606_v36 = vpack.c.bf16 %v656_v60, %v652_v37 }
 0x463   : > { %v416_v54 = vpop.permute.xlu1 %415  ;;  %1671 = vmatprep.subr.bf16.mxu0 %v1640_v15 }
 0x464   : > { %v664_v20 = vadd.f32 %v3082_v0, %v416_v54  ;;  %v666_v42 = vadd.f32 %v3084_v3, %v416_v54  ;;  %v1751_v37 = vpop.permute.xlu0 %1750 }
 0x466   : > { %v1607_v40 = vpack.c.bf16 %v664_v20, %v660_v8  ;;  %v1608_v62 = vpack.c.bf16 %v666_v42, %v662_v6  ;;  %v2255_v6 = vld [vmem:[%s2325_s23 + $0x28] sm:$0xff] }
 0x467   : > { %v1746_v44 = vpop.permute.xlu1 %1745 }
 0x468   : > { %1672 = vmatpush1.bf16.xpose.msra.mxu0 %v1639_v55  ;;  %v2257_v55 = vld [vmem:[%s2325_s23 + $0x38] sm:$0xff] }
 0x46b   : > { %v1756_v15 = vpop.permute.xlu1 %1755 }
 0x46f   : > { %1674 = vmatmul.mubr.bf16.vlgmr.msra.gmra.mrb[48].mxu0 %v1601_v46 }
 0x470   : > { %1683 = vmatprep.mubr.bf16.mxu0 %v1604_v35 }
 0x477   : > { %1684 = vmatmul.mubr.bf16.gmra.mrb[52].mxu0 %v1603_v12 }
 0x478   : > { %1693 = vmatprep.mubr.bf16.mxu0 %v1606_v36 }
 0x47f   : > { %1694 = vmatmul.mubr.bf16.gmra.mrb[56].mxu0 %v1605_v45 }
 0x480   : > { %1703 = vmatprep.mubr.bf16.mxu0 %v1608_v62 }
 0x487   : > { %1704 = vmatmul.mubr.bf16.gmra.mrb[60].mxu0 %v1607_v40  ;;  %v2256_v40 = vld [vmem:[%s2325_s23 + $0x30] sm:$0xff] }
 0x542   : > { %v1675_v57 = vpop.f32.mrb[48].mxu0 }
 0x543   : > { %v1677_v51 = vpop.f32.mrb[49].mxu0 }
 0x544   : > { %v1679_v23 = vpop.f32.mrb[50].mxu0 }
 0x545   : > { %v1722_v2 = vpack.c.bf16 %v1679_v23, %v1675_v57  ;;  %v1681_v33 = vpop.f32.mrb[51].mxu0 }
 0x546   : > { %v1723_v41 = vpack.c.bf16 %v1681_v33, %v1677_v51  ;;  %v1761_v51 = vpop.permute.xlu0 %1760 }
 0x548   : > { %1810 = vmatprep.subr.bf16.mxu1 %v1723_v41  ;;  %v1766_v41 = vpop.permute.xlu1 %1765 }
 0x549   : > { %1811 = vmatpush1.bf16.msra.mxu1 %v1722_v2 }
 0x54a   : > { %v1685_v0 = vpop.f32.mrb[52].mxu0 }
 0x54b   : > { %v1687_v3 = vpop.f32.mrb[53].mxu0 }
 0x54c   : > { %v1689_v47 = vpop.f32.mrb[54].mxu0 }
 0x54d   : > { %v1724_v27 = vpack.c.bf16 %v1689_v47, %v1685_v0  ;;  %v1691_v25 = vpop.f32.mrb[55].mxu0  ;;  %v2258_v47 = vld [vmem:[%s2325_s23 + $0x40] sm:$0xff] }
 0x54e   : > { %v1725_v31 = vpack.c.bf16 %v1691_v25, %v1687_v3 }
 0x550   : > { %1812 = vmatprep.subr.bf16.mxu1 %v1725_v31 }
 0x551   : > { %1813 = vmatpush1.bf16.msra.mxu1 %v1724_v27 }
 0x552   : > { %v1695_v34 = vpop.f32.mrb[56].mxu0 }
 0x553   : > { %v1697_v48 = vpop.f32.mrb[57].mxu0 }
 0x554   : > { %v1699_v14 = vpop.f32.mrb[58].mxu0 }
 0x555   : > { %v1726_v19 = vpack.c.bf16 %v1699_v14, %v1695_v34  ;;  %v1701_v22 = vpop.f32.mrb[59].mxu0  ;;  %v2259_v34 = vld [vmem:[%s2325_s23 + $0x48] sm:$0xff] }
 0x556   : > { %v1727_v61 = vpack.c.bf16 %v1701_v22, %v1697_v48 }
 0x558   : > { %1814 = vmatprep.subr.bf16.mxu1 %v1727_v61  ;;  %v2261_v61 = vld [vmem:[%s2325_s23 + $0x58] sm:$0xff] }
 0x559   : > { %1815 = vmatpush1.bf16.msra.mxu1 %v1726_v19  ;;  %v2260_v19 = vld [vmem:[%s2325_s23 + $0x50] sm:$0xff] }
 0x55a   : > { %v1705_v50 = vpop.f32.mrb[60].mxu0 }
 0x55b   : > { %v1707_v38 = vpop.f32.mrb[61].mxu0 }
 0x55c   : > { %v1709_v46 = vpop.f32.mrb[62].mxu0 }
 0x55d   : > { %v1728_v52 = vpack.c.bf16 %v1709_v46, %v1705_v50  ;;  %v1711_v26 = vpop.f32.mrb[63].mxu0 }
 0x55e   : > { %v1729_v43 = vpack.c.bf16 %v1711_v26, %v1707_v38  ;;  %v1771_v38 = vpop.permute.xlu0 %1770 }
 0x560   : > { %1816 = vmatprep.subr.bf16.mxu1 %v1729_v43  ;;  %v1776_v43 = vpop.permute.xlu1 %1775 }
 0x561   : > { %1817 = vmatpush1.bf16.msra.mxu1 %v1728_v52 }
 0x564   : > { %2023 = vmatmul.mubr.msk.bf16.vlgmr.msra.gmra.mrb[64].mxu1 %vm478_vm0, %v2054_v13 }
 0x565   : > { %1852 = vmatprep.mubr.bf16.mxu1 %v3238_v9 }
 0x56c   : > { %2024 = vmatmul.mubr.msk.bf16.gmra.mrb[68].mxu1 %vm478_vm0, %v2055_v24  ;;  %v2262_v24 = vld [vmem:[%s2325_s23 + $0x60] sm:$0xff] }
 0x56d   : > { %1862 = vmatprep.mubr.bf16.mxu1 %v3238_v9 }
 0x574   : > { %2025 = vmatmul.mubr.msk.bf16.gmra.mrb[72].mxu1 %vm478_vm0, %v2056_v10 }
 0x575   : > { %1872 = vmatprep.mubr.bf16.mxu1 %v3238_v9 }
 0x57c   : > { %2026 = vmatmul.mubr.msk.bf16.gmra.mrb[76].mxu1 %vm478_vm0, %v2057_v18 }
 0x637   : > { %v1844_v56 = vpop.f32.mrb[64].mxu1 }
 0x638   : > { %v1845_v58 = vadd.f32 %v1844_v56, %v1741_v7  ;;  %v1846_v49 = vpop.f32.mrb[65].mxu1  ;;  %v2263_v56 = vld [vmem:[%s2325_s23 + $0x68] sm:$0xff] }
 0x639   : > { %v1847_v29 = vadd.f32 %v1846_v49, %v1741_v7  ;;  %v1848_v39 = vpop.f32.mrb[66].mxu1 }
 0x63a   : > { %v1883_v1 = vadd.f32 %v2250_v59, %v1845_v58  ;;  %v1849_v21 = vadd.f32 %v1848_v39, %v1746_v44  ;;  %v1850_v4 = vpop.f32.mrb[67].mxu1  ;;  %v2265_v39 = vld [vmem:[%s2325_s23 + $0x78] sm:$0xff] }
 0x63b   : > { %v1884_v12 = vadd.f32 %v2251_v17, %v1847_v29  ;;  %v1851_v35 = vadd.f32 %v1850_v4, %v1746_v44  ;;  %v2264_v44 = vld [vmem:[%s2325_s23 + $0x70] sm:$0xff] }
 0x63c   : > { %1899 = vst [vmem:[%s3154_s13] sm:$0xff] %v1883_v1  ;;  %v1885_v11 = vadd.f32 %v2252_v16, %v1849_v21 }
 0x63d   : > { %1900 = vst [vmem:[%s3154_s13 + $0x8] sm:$0xff] %v1884_v12  ;;  %v1886_v63 = vadd.f32 %v2253_v30, %v1851_v35 }
 0x63e   : > { %1901 = vst [vmem:[%s3154_s13 + $0x10] sm:$0xff] %v1885_v11 }
 0x63f   : > { %1902 = vst [vmem:[%s3154_s13 + $0x18] sm:$0xff] %v1886_v63  ;;  %v1854_v53 = vpop.f32.mrb[68].mxu1 }
 0x640   : > { %v1855_v60 = vadd.f32 %v1854_v53, %v1751_v37  ;;  %v1856_v32 = vpop.f32.mrb[69].mxu1 }
 0x641   : > { %v1857_v45 = vadd.f32 %v1856_v32, %v1751_v37  ;;  %v1858_v36 = vpop.f32.mrb[70].mxu1 }
 0x642   : > { %v1887_v54 = vadd.f32 %v2254_v28, %v1855_v60  ;;  %v1859_v5 = vadd.f32 %v1858_v36, %v1756_v15  ;;  %v1860_v8 = vpop.f32.mrb[71].mxu1 }
 0x643   : > { %v1888_v20 = vadd.f32 %v2255_v6, %v1857_v45  ;;  %v1861_v42 = vadd.f32 %v1860_v8, %v1756_v15 }
 0x644   : > { %1903 = vst [vmem:[%s3154_s13 + $0x20] sm:$0xff] %v1887_v54  ;;  %v1889_v62 = vadd.f32 %v2256_v40, %v1859_v5 }
 0x645   : > { %1904 = vst [vmem:[%s3154_s13 + $0x28] sm:$0xff] %v1888_v20  ;;  %v1890_v57 = vadd.f32 %v2257_v55, %v1861_v42 }
 0x646   : > { %1905 = vst [vmem:[%s3154_s13 + $0x30] sm:$0xff] %v1889_v62 }
 0x647   : > { %1906 = vst [vmem:[%s3154_s13 + $0x38] sm:$0xff] %v1890_v57  ;;  %v1864_v23 = vpop.f32.mrb[72].mxu1 }
 0x648   : > { %v1865_v2 = vadd.f32 %v1864_v23, %v1761_v51  ;;  %v1866_v33 = vpop.f32.mrb[73].mxu1 }
 0x649   : > { %v1867_v0 = vadd.f32 %v1866_v33, %v1761_v51  ;;  %v1868_v3 = vpop.f32.mrb[74].mxu1 }
 0x64a   : > { %v1891_v27 = vadd.f32 %v2258_v47, %v1865_v2  ;;  %v1869_v25 = vadd.f32 %v1868_v3, %v1766_v41  ;;  %v1870_v31 = vpop.f32.mrb[75].mxu1 }
 0x64b   : > { %v1892_v48 = vadd.f32 %v2259_v34, %v1867_v0  ;;  %v1871_v14 = vadd.f32 %v1870_v31, %v1766_v41 }
 0x64c   : > { %1907 = vst [vmem:[%s3154_s13 + $0x40] sm:$0xff] %v1891_v27  ;;  %v1893_v22 = vadd.f32 %v2260_v19, %v1869_v25 }
 0x64d   : > { %1908 = vst [vmem:[%s3154_s13 + $0x48] sm:$0xff] %v1892_v48  ;;  %v1894_v50 = vadd.f32 %v2261_v61, %v1871_v14 }
 0x64e   : > { %1909 = vst [vmem:[%s3154_s13 + $0x50] sm:$0xff] %v1893_v22 }
 0x64f   : > { %1910 = vst [vmem:[%s3154_s13 + $0x58] sm:$0xff] %v1894_v50  ;;  %v1874_v46 = vpop.f32.mrb[76].mxu1 }
 0x650   : > { %v1875_v52 = vadd.f32 %v1874_v46, %v1771_v38  ;;  %v1876_v26 = vpop.f32.mrb[77].mxu1 }
 0x651   : > { %v1877_v13 = vadd.f32 %v1876_v26, %v1771_v38  ;;  %v1878_v9 = vpop.f32.mrb[78].mxu1 }
 0x652   : > { %v1895_v10 = vadd.f32 %v2262_v24, %v1875_v52  ;;  %v1879_v18 = vadd.f32 %v1878_v9, %v1776_v43  ;;  %v1880_v7 = vpop.f32.mrb[79].mxu1 }
 0x653   : > { %v1896_v58 = vadd.f32 %v2263_v56, %v1877_v13  ;;  %v1881_v49 = vadd.f32 %v1880_v7, %v1776_v43 }
 0x654   : > { %1911 = vst [vmem:[%s3154_s13 + $0x60] sm:$0xff] %v1895_v10  ;;  %v1897_v29 = vadd.f32 %v2264_v44, %v1879_v18 }
 0x655   : > { %1912 = vst [vmem:[%s3154_s13 + $0x68] sm:$0xff] %v1896_v58  ;;  %v1898_v59 = vadd.f32 %v2265_v39, %v1881_v49 }
 0x656   : > { %1913 = vst [vmem:[%s3154_s13 + $0x70] sm:$0xff] %v1897_v29 }
 0x657   : > { %1914 = vst [vmem:[%s3154_s13 + $0x78] sm:$0xff] %v1898_v59 }
 0x658 PF: > { %s15_s18 = sadd.s32 1, %s2272_s18  }
 0x659   : > { %p12_p4 = scmp.ge.s32.totalorder %s15_s18, 4  }
 0x65b   :  { %14 = sbr.rel (!%p12_p4) target bundleno = 1 (0x1), region = 70 }

</bundles_post_ra>
